<compile_context>
chip_gen: v6e
topology: v6e:2x2x1
jax: 0.10.0
libtpu: 0.0.40
codegen_flags: <defaults>
</compile_context>

<pallas_src>
import jax
import jax.numpy as jnp
from jax.experimental import pallas as pl
from jax.experimental.pallas import tpu as pltpu


def _round_up(x, m):
    return ((x + m - 1) // m) * m


def _cdiv(a, b):
    return -(-a // b)


def _legalize_tile(t, dim, granule):
    """Tile must be a multiple of `granule` or exactly `dim` (full extent)."""
    t = min(int(t), dim)
    if t == dim:
        return t
    t = (t // granule) * granule
    if t <= 0:
        return dim
    return t


def _sigmoid(x):
    # 0.5*(tanh(x/2)+1): keeps the transcendental on the EUP and avoids a
    # full-tile divide on the VPU in the epilogue.
    return 0.5 * jnp.tanh(0.5 * x) + 0.5


def _make_kernel(nk, precision):
    """nk = number of k-steps (static)."""

    def kernel(x1_ref, x2_ref, inp_ref, o_ref):
        part = jnp.dot(
            x2_ref[...],
            inp_ref[...],
            preferred_element_type=jnp.float32,
            precision=precision,
        )
        if nk == 1:
            # Single k-step: one fused write.
            o_ref[...] = part * _sigmoid(x1_ref[...])
        else:
            k = pl.program_id(2)

            @pl.when(k == 0)
            def _():
                o_ref[...] = part  # no zero-init pass needed

            @pl.when(jnp.logical_and(k > 0, k < nk - 1))
            def _():
                o_ref[...] += part

            @pl.when(k == nk - 1)
            def _():
                # Fused final accumulate + gate: saves one full tile RMW pass.
                o_ref[...] = (o_ref[...] + part) * _sigmoid(x1_ref[...])

    return kernel


def mm_sigmoid(
    x1,
    x2,
    inp,
    *,
    tm=None,
    tn=None,
    tk=None,
    precision=jax.lax.Precision.HIGHEST,
):
    M, K = x2.shape
    K2, N = inp.shape
    assert K == K2, (K, K2)
    assert x1.shape == (M, N), (x1.shape, (M, N))

    # ---- generation-aware defaults ----
    try:
        vmem_cap = pltpu.get_tpu_info().vmem_capacity_bytes
    except Exception:
        vmem_cap = 64 << 20  # conservative (v7x-sized)
    big_vmem = vmem_cap >= (100 << 20)  # v5e / v6e: 128 MiB per core
    tm_d, tn_d, tk_d = (1024, 1024, 2048) if big_vmem else (512, 512, 1024)
    vmem_cap_limit = (100 << 20) if big_vmem else (48 << 20)

    user_tiles = (tm is not None) or (tn is not None) or (tk is not None)
    tm = _legalize_tile(tm if tm is not None else tm_d, M, 8)
    tn = _legalize_tile(tn if tn is not None else tn_d, N, 128)

    # ---- K tiling: tk == K => single k-step, no padding.  Otherwise tk is a
    # 128-multiple dividing round_up(K, 128) (pads < 128 columns of zeros). ----
    if tk is not None:
        tk = min(int(tk), K)
        if tk < K:
            tk = max(128, (tk // 128) * 128)
            Kp = _round_up(K, tk)
        else:
            Kp = K
    else:
        if K <= tk_d:
            tk, Kp = K, K
        else:
            Kp = _round_up(K, 128)
            m = Kp // 128
            d = 1
            for cand in range(tk_d // 128, 0, -1):
                if m % cand == 0:
                    d = cand
                    break
            tk = 128 * d

    if not user_tiles:
        # >= 2 output blocks so input DMA pipelines with compute (prefer
        # splitting M to keep lane-dense output tiles).
        if _cdiv(M, tm) * _cdiv(N, tn) < 2:
            if M > 8:
                tm = _legalize_tile(max(8, _round_up(_cdiv(tm, 2), 8)), M, 8)
            elif N > 128:
                tn = _legalize_tile(max(128, _round_up(_cdiv(tn, 2), 128)), N, 128)
        # Dual-TensorCore parts (64 MiB VMEM proxy): keep parallel grid even.
        if not big_vmem:
            gm, gn = _cdiv(M, tm), _cdiv(N, tn)
            if gm * gn >= 2 and (gm * gn) % 2 == 1:
                tm_half = _legalize_tile(max(8, _round_up(_cdiv(tm, 2), 8)), M, 8)
                tn_half = _legalize_tile(
                    max(128, _round_up(_cdiv(tn, 2), 128)), N, 128
                )
                if M > 8 and _cdiv(M, tm_half) % 2 == 0:
                    tm = tm_half
                elif N > 128 and _cdiv(N, tn_half) % 2 == 0:
                    tn = tn_half

    # ---- zero-pad K only (exact for the reduction); M/N edge blocks are
    # handled by Pallas write-masking and never reach valid output. ----
    if Kp != K:
        x2 = jnp.pad(x2, ((0, 0), (0, Kp - K)))
        inp = jnp.pad(inp, ((0, Kp - K), (0, 0)))

    grid = (_cdiv(M, tm), _cdiv(N, tn), Kp // tk)
    nk = grid[2]

    # Double-buffered inputs + resident f32 output tile, plus margin.
    footprint = 4 * (2 * (tm * tk + tk * tn + tm * tn) + 2 * tm * tn)
    vmem_limit = int(min(max(footprint + (8 << 20), 32 << 20), vmem_cap_limit))

    cost = pl.CostEstimate(
        flops=2 * M * N * K,
        transcendentals=M * N,
        bytes_accessed=4 * (M * K + K * N + 2 * M * N),
    )

    return pl.pallas_call(
        _make_kernel(nk, precision),
        out_shape=jax.ShapeDtypeStruct((M, N), jnp.float32),
        grid_spec=pltpu.PrefetchScalarGridSpec(
            num_scalar_prefetch=0,
            grid=grid,
            in_specs=[
                # TODO(synk): single-buffer the k-invariant gate tile
                # (pipeline_mode=pl.Buffered(1)) once confirmed supported.
                pl.BlockSpec((tm, tn), lambda i, j, k: (i, j)),  # x1 (gate)
                pl.BlockSpec((tm, tk), lambda i, j, k: (i, k)),  # x2 (lhs)
                pl.BlockSpec((tk, tn), lambda i, j, k: (k, j)),  # inp (rhs)
            ],
            out_specs=pl.BlockSpec((tm, tn), lambda i, j, k: (i, j)),
        ),
        compiler_params=pltpu.CompilerParams(
            # K (axis 2) is the reduction and MUST stay innermost/"arbitrary".
            dimension_semantics=("parallel", "parallel", "arbitrary"),
            vmem_limit_bytes=vmem_limit,
        ),
        cost_estimate=cost,
    )(x1, x2, inp)


if __name__ == "__main__":
    # Small shapes consistent with the module: x2 (M,K) @ inp (K,N), x1 (M,N).
    M, K, N = 128, 256, 128
    key = jax.random.PRNGKey(0)
    k1, k2, k3 = jax.random.split(key, 3)
    x1 = jax.random.normal(k1, (M, N), dtype=jnp.float32)
    x2 = jax.random.normal(k2, (M, K), dtype=jnp.float32)
    inp = jax.random.normal(k3, (K, N), dtype=jnp.float32)

    out = mm_sigmoid(x1, x2, inp)
    jax.block_until_ready(out)
    ref = jnp.dot(
        x2, inp, precision=jax.lax.Precision.HIGHEST
    ) * jax.nn.sigmoid(x1)
    assert out.shape == (M, N)
    assert jnp.allclose(out, ref, atol=1e-4, rtol=1e-4)

    # Exercise ragged M/N edge blocks + multi-k accumulation + K zero-padding
    # at small size by forcing small tiles.
    M2, K2, N2 = 200, 300, 260
    k4, k5, k6 = jax.random.split(jax.random.PRNGKey(1), 3)
    y1 = jax.random.normal(k4, (M2, N2), dtype=jnp.float32)
    y2 = jax.random.normal(k5, (M2, K2), dtype=jnp.float32)
    yin = jax.random.normal(k6, (K2, N2), dtype=jnp.float32)
    out2 = mm_sigmoid(y1, y2, yin, tm=64, tn=128, tk=128)
    jax.block_until_ready(out2)
    ref2 = jnp.dot(
        y2, yin, precision=jax.lax.Precision.HIGHEST
    ) * jax.nn.sigmoid(y1)
    assert out2.shape == (M2, N2)
    assert jnp.allclose(out2, ref2, atol=2e-3, rtol=2e-3)

    print("KERNEL_OK")
</pallas_src>

<mosaic_0001>
module attributes {stable_mosaic.version = 11 : i64} {
  func.func @kernel(%arg0: i32, %arg1: i32, %arg2: i32, %arg3: memref<64x128xf32, #tpu.memory_space<vmem>>, %arg4: memref<64x256xf32, #tpu.memory_space<vmem>>, %arg5: memref<256x128xf32, #tpu.memory_space<vmem>>, %arg6: memref<64x128xf32, #tpu.memory_space<vmem>>) attributes {dimension_semantics = [#tpu.dimension_semantics<parallel>, #tpu.dimension_semantics<parallel>, #tpu.dimension_semantics<arbitrary>], iteration_bounds = array<i64: 2, 1, 1>, scalar_prefetch = 0 : i64, scratch_operands = 0 : i64, tpu.core_type = #tpu.core_type<tc>, window_params = [{transform_indices = @transform_0, window_bounds = array<i64: 64, 128>}, {transform_indices = @transform_1, window_bounds = array<i64: 64, 256>}, {transform_indices = @transform_2, window_bounds = array<i64: 256, 128>}, {transform_indices = @transform_3, window_bounds = array<i64: 64, 128>}]} {
    %c0 = arith.constant 0 : index
    %c0_0 = arith.constant 0 : index
    %0 = vector.load %arg4[%c0, %c0_0] : memref<64x256xf32, #tpu.memory_space<vmem>>, vector<64x256xf32>
    %c0_1 = arith.constant 0 : index
    %c0_2 = arith.constant 0 : index
    %1 = vector.load %arg5[%c0_1, %c0_2] : memref<256x128xf32, #tpu.memory_space<vmem>>, vector<256x128xf32>
    %cst = arith.constant dense<0.000000e+00> : vector<64x128xf32>
    %2 = tpu.matmul %0, %1, %cst {dimension_numbers = #tpu.dot_dimension_numbers<[1], [0], [0], [1], [0, 0, 1, 1], [], []>, precision = #tpu.contract_precision<fp32>} : vector<64x256xf32>, vector<256x128xf32>, vector<64x128xf32> -> vector<64x128xf32>
    %c0_3 = arith.constant 0 : index
    %c0_4 = arith.constant 0 : index
    %3 = vector.load %arg3[%c0_3, %c0_4] : memref<64x128xf32, #tpu.memory_space<vmem>>, vector<64x128xf32>
    %cst_5 = arith.constant 5.000000e-01 : f32
    %4 = vector.broadcast %cst_5 : f32 to vector<64x128xf32>
    %5 = arith.mulf %4, %3 : vector<64x128xf32>
    %6 = math.tanh %5 : vector<64x128xf32>
    %cst_6 = arith.constant 5.000000e-01 : f32
    %7 = vector.broadcast %cst_6 : f32 to vector<64x128xf32>
    %8 = arith.mulf %7, %6 : vector<64x128xf32>
    %cst_7 = arith.constant 5.000000e-01 : f32
    %9 = vector.broadcast %cst_7 : f32 to vector<64x128xf32>
    %10 = arith.addf %8, %9 : vector<64x128xf32>
    %11 = arith.mulf %2, %10 : vector<64x128xf32>
    %c0_8 = arith.constant 0 : index
    %c0_9 = arith.constant 0 : index
    %12 = vector.load %arg6[%c0_8, %c0_9] : memref<64x128xf32, #tpu.memory_space<vmem>>, vector<64x128xf32>
    tpu.vector_store %arg6[%c0_8, %c0_9], %11 {strides = array<i32>} : memref<64x128xf32, #tpu.memory_space<vmem>>, vector<64x128xf32>,
    return
  }
  func.func @transform_0(%arg0: i32, %arg1: i32, %arg2: i32) -> (i32, i32) {
    %c0_i32 = arith.constant 0 : i32
    return %arg0, %arg1 : i32, i32
  }
  func.func @transform_1(%arg0: i32, %arg1: i32, %arg2: i32) -> (i32, i32) {
    %c0_i32 = arith.constant 0 : i32
    return %arg0, %arg2 : i32, i32
  }
  func.func @transform_2(%arg0: i32, %arg1: i32, %arg2: i32) -> (i32, i32) {
    %c0_i32 = arith.constant 0 : i32
    return %arg2, %arg1 : i32, i32
  }
  func.func @transform_3(%arg0: i32, %arg1: i32, %arg2: i32) -> (i32, i32) {
    %c0_i32 = arith.constant 0 : i32
    return %arg0, %arg1 : i32, i32
  }
}

</mosaic_0001>

<bundles_post_ra>
// kernel: tpu_custom_call.1
= control target key start
LH: loop header
LB: loop body
LE: loop exit
PB: predicated region body
PF: predicated region fallthrough
CT: control target
= control target key end

     0   :  { %s3691_s0 = inlined_call_operand.hbm [shape: f32[128,128], index: 0, kind: input, shape index: {}]   ;;  %s3692_s1 = inlined_call_operand.hbm [shape: f32[128,256], index: 1, kind: input, shape index: {}]   ;;  %s3693_s2 = inlined_call_operand.hbm [shape: f32[256,128], index: 2, kind: input, shape index: {}]   ;;  %s3694_s3 = inlined_call_operand.hbm [shape: f32[128,128], index: 3, kind: output, shape index: {}]  }
   0x1   :  { %3839 = sst [smem:[#allocation74_spill]] %s3691_s0 }
   0x2   :  { %3840 = sst [smem:[#allocation75_spill]] %s3693_s2 }
   0x3   :  { %8 = vsyncpa [#allocation3], 0 }
   0x4   :  { %10 = vsyncpa [#allocation3 + $0x1], 0 }
   0x5   :  { %11 = vsyncpa [#allocation6], 0 }
   0x6   :  { %13 = vsyncpa [#allocation6 + $0x1], 0 }
   0x7   :  { %14 = vsyncpa [#allocation4], 0 }
   0x8   :  { %16 = vsyncpa [#allocation4 + $0x1], 0  ;;  %s2452_s12 = smov 0   ;;  %s2454_s13 = smov 0  }
   0x9   :  { %s2456_s14 = smov 0   ;;  %s2458_s15 = smov 0  }
   0xa   :  { %s2460_s16 = smov 0   ;;  %s2462_s17 = smov 0  }
   0xb LB: > { %3841 = sst [smem:[#allocation13_spill]] %s2408_s14  ;;  %s2483_s18 = sadd.s32 4294967295, %s2420_s17   ;;  %s2420_s17 = sphi %s2462_s17, %s22_s17   ;;  %s2416_s16 = sphi %s2460_s16, %s4080_s16   ;;  %s2412_s15 = sphi %s2458_s15, %s4079_s15   ;;  %s2408_s14 = sphi %s2456_s14, %s4075_s14   ;;  %s2404_s13 = sphi %s2454_s13, %s4078_s13   ;;  %s2400_s12 = sphi %s2452_s12, %s4077_s12  }
   0xc   : > { %s1789_s19 = sadd.s32 4294967294, %s2420_s17   ;;  %p63_p0 = scmp.ne.s32.totalorder %s2404_s13, %s2400_s12 }
   0xd   : > { %p64_p1 = scmp.eq.s32.totalorder %s2483_s18, 0  ;;  %p151_p3 = scmp.eq.s32.totalorder %s1789_s19, 1 }
   0xe   : > { %p1790_p5 = scmp.ge.s32.totalorder %s2420_s17, 1  ;;  %p158_p7 = scmp.lt.s32.totalorder %s2420_s17, 3 }
   0xf   : > { %p2492_p4 = por %p64_p1, %p63_p0  ;;  %p2497_p6 = por %p151_p3, %p63_p0 }
  0x10   : > { %p2502_p8 = pnand %p1790_p5, %p158_p7  ;;  %s2422_s23 = smov [#allocation7]  }
  0x11   : > { %s3843_s21 = scalar_select %p2497_p6, 1, 0 }
  0x12   : > { %s174_s24 = sshll.u32 %s2422_s23, 4  ;;  %p2160_p9 = pneg %p2502_p8  ;;  %s175_s24 = int_to_ptr.vmem [resolvable:$true] %s174_s24 }
  0x13   : > { %p1792_p10 = scmp.ge.s32.totalorder %s2420_s17, 2  ;;  %s41_s26 = sadd.s32 1, %s2416_s16 }
  0x14   : > { %p2511_p11 = pnand %p2160_p9, %p64_p1  ;;  %s2261_s27 = scalar_lea.vmem %s175_s24, 4096 }
  0x15   : > { %p2262_p13 = scmp.ne.s32.totalorder %s175_s24, %s2261_s27  ;;  %p2269_p5 = scmp.lt.s32.totalorder %s175_s24, %s175_s24 }
  0x16   : > { %p2252_p12 = pneg %p2511_p11  ;;  %p2270_p7 = scmp.lt.s32.totalorder %s2261_s27, %s2261_s27 }
  0x18   : > { %p2264_p0 = pnand %p2262_p13, %p2252_p12  ;;  %p2271_p2 = por %p2270_p7, %p2269_p5 }
  0x1a   : > { %p2265_p3 = pneg %p2264_p0 }
  0x1c   : > { %p2272_p6 = pnand %p2271_p2, %p2265_p3 }
  0x1e   : > { %2275 = shalt.err (!%p2272_p6)
}
  0x1f   : > { %s3695_s28 = smov 128   ;;  %s3696_s29 = smov 8  }
  0x20   : > { %s3846_s2 = sld [smem:[#allocation75_spill]]  ;;  %p43_p2 = scmp.ge.s32.totalorder %s41_s26, 2 }
  0x21   : > { %s50_s5 = sadd.s32 1, %s2408_s14  ;;  %p57_p6 = scmp.ne.s32.totalorder %s2408_s14, %s2404_s13 }
  0x22   : > { %p58_p9 = scmp.eq.s32.totalorder %s2420_s17, 0  ;;  %s4082_s26 = smov (%p43_p2, %s41_s26), 0 }
  0x23   : > { %3847 = sst [smem:[#allocation14_spill]] %s4082_s26  ;;  %p3849_p13 = scmp.eq.s32.totalorder %s2483_s18, 1 }
  0x24   : > { %p2532_p12 = por %p58_p9, %p57_p6  ;;  %s45_s8 = ssub.s32 %s2416_s16, %s4082_s26 }
  0x25   : > { %p2538_p0 = por %p3849_p13, %p57_p6  ;;  %p48_p3 = scmp.eq.s32.totalorder %s45_s8, 0 }
  0x26   : > { %2163 = dma.hbm_to_vmem [thread:$0]  (!%p2511_p11), %s3846_s2, 4096, %s175_s24, [#allocation6], %s3695_s28, %s3695_s28, %s3696_s29  }
  0x27   : > { %p2176_p11 = scmp.lt.s32.totalorder %s2420_s17, 2  ;;  %s2546_s9 = sand.u32 1, %s2408_s14  }
  0x28   : > { %s1793_s10 = sshll.u32 %s2546_s9, 6  ;;  %s1810_s19 = sshll.u32 %s2416_s16, 10 }
  0x29   : > { %s2550_s11 = scalar_select %p48_p3, %s2408_s14, %s50_s5  }
  0x2a   : > { %s3852_s0 = sld [smem:[#allocation74_spill]]  ;;  %s192_s27 = scalar_lea.vmem [#allocation2], %s1793_s10 }
  0x2b   : > { %3851 = sst [smem:[#allocation15_spill]] %s2550_s11  ;;  %s200_s30 = sshll.u32 %s192_s27, 4  ;;  %s201_s30 = int_to_ptr.vmem [resolvable:$true] %s200_s30 }
  0x2c   : > { %p2558_p5 = pnand %p2176_p11, %p2532_p12  ;;  %s210_s8 = sand.u32 1, %s2420_s17  }
  0x2d   : > { %s1796_s28 = sshll.u32 %s2546_s9, 7  ;;  %s189_s29 = scalar_lea.sflag [#allocation3], %s2546_s9 }
  0x2e   : > { %p2278_p7 = pneg %p2558_p5  ;;  %s2289_s5 = scalar_lea.vmem %s201_s30, 1024 }
  0x2f   : > { %p2290_p2 = scmp.ne.s32.totalorder %s201_s30, %s2289_s5  ;;  %s2425_s10 = smov [#allocation2]  }
  0x30   : > { %s199_s25 = scalar_lea.hbm %s3852_s0, %s1810_s19  ;;  %s2294_s19 = sshll.u32 %s2425_s10, 4  ;;  %s2295_s19 = int_to_ptr.vmem [resolvable:$false] %s2294_s19 }
  0x31   : > { %p2292_p6 = pnand %p2290_p2, %p2278_p7  ;;  %s2296_s6 = scalar_lea.vmem %s2295_s19, 2048 }
  0x32   : > { %p2297_p12 = scmp.lt.s32.totalorder %s201_s30, %s2295_s19  ;;  %p2298_p13 = scmp.lt.s32.totalorder %s2296_s6, %s2289_s5 }
  0x33   : > { %p2293_p9 = pneg %p2292_p6 }
  0x34   : > { %p2299_p11 = por %p2298_p13, %p2297_p12 }
  0x36   : > { %p2300_p3 = pnand %p2299_p11, %p2293_p9 }
  0x38   : > { %2303 = shalt.err (!%p2300_p3)
}
  0x39   : > { %s3854_s9 = smov 8   ;;  %s3855_s23 = smov 128  }
  0x3a   : > { %2167 = dma.hbm_to_vmem [thread:$0]  (!%p2558_p5), %s199_s25, 1024, %s201_s30, %s189_s29, %s3855_s23, %s3855_s23, %s3854_s9  }
  0x3b   : > { %s1812_s24 = sshll.u32 %s2416_s16, 11  ;;  %s214_s2 = scalar_lea.vmem [#allocation5], %s1796_s28 }
  0x3c   : > { %s223_s10 = scalar_lea.hbm %s3692_s1, %s1812_s24  ;;  %s224_s26 = sshll.u32 %s214_s2, 4  ;;  %s225_s26 = int_to_ptr.vmem [resolvable:$true] %s224_s26 }
  0x3d   : > { %s211_s5 = scalar_lea.sflag [#allocation6], %s210_s8  ;;  %s2317_s19 = scalar_lea.vmem %s225_s26, 2048 }
  0x3e   : > { %p2318_p2 = scmp.ne.s32.totalorder %s225_s26, %s2317_s19  ;;  %s2426_s6 = smov [#allocation5]  }
  0x3f   : > { %s2322_s11 = sshll.u32 %s2426_s6, 4  ;;  %s2323_s11 = int_to_ptr.vmem [resolvable:$false] %s2322_s11 }
  0x40   : > { %p2320_p6 = pnand %p2318_p2, %p2278_p7  ;;  %s2324_s14 = scalar_lea.vmem %s2323_s11, 4096 }
  0x41   : > { %p2325_p12 = scmp.lt.s32.totalorder %s225_s26, %s2323_s11  ;;  %p2326_p13 = scmp.lt.s32.totalorder %s2324_s14, %s2317_s19 }
  0x42   : > { %p2321_p9 = pneg %p2320_p6 }
  0x43   : > { %p2327_p11 = por %p2326_p13, %p2325_p12 }
  0x45   : > { %p2328_p3 = pnand %p2327_p11, %p2321_p9 }
  0x47   : > { %2331 = shalt.err (!%p2328_p3)
}
  0x48   : > { %s2427_s0 = smov 256   ;;  %s2428_s2 = smov 16  }
  0x49   : > { %2170 = dma.hbm_to_vmem [thread:$0]  (!%p2558_p5), %s223_s10, 2048, %s225_s26, %s211_s5, %s2427_s0, %s2427_s0, %s2428_s2  }
  0x4a   : > { %236 = sbr.rel (%p2502_p8) target bundleno = 478 (0x1de), region = 32 }
  0x4f   : > { %s2587_s28 = sand.u32 1, %s2404_s13  }
  0x50   : > { %s1801_s29 = sshll.u32 %s2587_s28, 6  ;;  %s239_s14 = scalar_lea.sflag [#allocation3], %s2587_s28 }
  0x51   : > { %s2593_s11 = scalar_lea.vmem [#allocation2], %s1801_s29 }
  0x52   : > { %2383 = dma.done.wait (%p2492_p4), %s239_s14, 1024  }
  0x53   : > { %2385 = vsyncadd (%p2492_p4), %s239_s14, 4294966272  ;;  %s247_s22 = sand.u32 1, %s2483_s18   ;;  %s1802_s26 = sshll.u32 %s2587_s28, 7 }
  0x54   : > { %s248_s25 = scalar_lea.sflag [#allocation6], %s247_s22  ;;  %s2601_s30 = scalar_lea.vmem [#allocation5], %s1802_s26 }
  0x55   : > { %2387 = dma.done.wait (%p2492_p4), %s248_s25, 2048  }
  0x56   : > { %2389 = vsyncadd (%p2492_p4), %s248_s25, 4294965248 }
  0x57   : > { %2391 = dma.done.wait (%p64_p1), [#allocation6], 4096  }
  0x58   : > { %2393 = vsyncadd (%p64_p1), [#allocation6], 4294963200  ;;  %v335_v0 = vld [vmem:[#allocation7 + $0xf8] sm:$0xff]  ;;  %v334_v2 = vld [vmem:[#allocation7 + $0xf0] sm:$0xff]  ;;  %s3596_s18 = scalar_lea.vmem [#allocation8], %s1801_s29  ;;  %s1813_s20 = sshll.u32 %s2412_s15, 10 }
  0x59   : > { %v319_v1 = vld [vmem:[#allocation7 + $0x78] sm:$0xff]  ;;  %v2611_v3 = vand.u32 4294901760, %v335_v0  ;;  %v2615_v5 = vand.u32 4294901760, %v334_v2  ;;  %v318_v6 = vld [vmem:[#allocation7 + $0x70] sm:$0xff]  ;;  %v333_v7 = vld [vmem:[#allocation7 + $0xe8] sm:$0xff]  ;;  %s1661_s4 = sshll.u32 %s3596_s18, 4  ;;  %s3640_s23 = scalar_lea.hbm %s3694_s3, %s1813_s20  ;;  %s3642_s4 = int_to_ptr.vmem [resolvable:$true] %s1661_s4 }
  0x5a   : > { %v2613_v4 = vand.u32 4294901760, %v319_v1  ;;  %v317_v8 = vld [vmem:[#allocation7 + $0x68] sm:$0xff]  ;;  %v2617_v9 = vand.u32 4294901760, %v318_v6  ;;  %v2619_v10 = vand.u32 4294901760, %v333_v7  ;;  %v332_v12 = vld [vmem:[#allocation7 + $0xe0] sm:$0xff]  ;;  %v331_v14 = vld [vmem:[#allocation7 + $0xd8] sm:$0xff] }
  0x5b   : > { %v2621_v11 = vand.u32 4294901760, %v317_v8  ;;  %v316_v13 = vld [vmem:[#allocation7 + $0x60] sm:$0xff]  ;;  %1814 = vmatprep.subr.mxu0 %v2611_v3  ;;  %v2624_v15 = vand.u32 4294901760, %v332_v12  ;;  %v2628_v17 = vand.u32 4294901760, %v331_v14  ;;  %v2631_v18 = vsub.f32 %v335_v0, %v2611_v3  ;;  %v2633_v19 = vld [vmem:[#allocation7 + $0x58] sm:$0xff]  ;;  %v2635_v20 = vld [vmem:[#allocation7 + $0xd0] sm:$0xff] }
  0x5c   : > { %v2626_v16 = vand.u32 4294901760, %v316_v13  ;;  %v2637_v21 = vld [vmem:[#allocation7 + $0x50] sm:$0xff]  ;;  %1815 = vmatpush3.msra.mxu0 %v2613_v4  ;;  %v2641_v22 = vand.u32 4294901760, %v2633_v19  ;;  %v2644_v23 = vsub.f32 %v319_v1, %v2613_v4  ;;  %v2647_v24 = vand.u32 4294901760, %v2635_v20  ;;  %v2652_v26 = vld [vmem:[#allocation7 + $0xc8] sm:$0xff]  ;;  %v2656_v28 = vld [vmem:[#allocation7 + $0xc0] sm:$0xff] }
  0x5d   : > { %3856 = vst [vmem:[#allocation16_spill] sm:$0xff] %v2631_v18  ;;  %v2650_v25 = vsub.f32 %v334_v2, %v2615_v5  ;;  %v2654_v27 = vld [vmem:[#allocation7 + $0x48] sm:$0xff]  ;;  %1816 = vmatprep.subr.mxu0 %v2615_v5  ;;  %v3712_v29 = vand.u32 4294901760, %v2631_v18  ;;  %v2661_v30 = vand.u32 4294901760, %v2637_v21  ;;  %v2664_v31 = vsub.f32 %v318_v6, %v2617_v9  ;;  %v2678_v37 = vld [vmem:[#allocation7 + $0x40] sm:$0xff]  ;;  %v2702_v46 = vld [vmem:[#allocation7 + $0xb8] sm:$0xff] }
  0x5e   : > { %3857 = vst [vmem:[#allocation17_spill] sm:$0xff] %v2644_v23  ;;  %3858 = vst [vmem:[#allocation18_spill] sm:$0xff] %v2647_v24  ;;  %v2667_v32 = vand.u32 4294901760, %v2652_v26  ;;  %1817 = vmatpush3.msra.mxu0 %v2617_v9  ;;  %v3710_v33 = vand.u32 4294901760, %v2644_v23  ;;  %v2673_v35 = vsub.f32 %v333_v7, %v2619_v10  ;;  %v2676_v36 = vand.u32 4294901760, %v2654_v27  ;;  %v2712_v51 = vld [vmem:[#allocation7 + $0x38] sm:$0xff] }
  0x5f   : > { %3859 = vst [vmem:[#allocation19_spill] sm:$0xff] %v2650_v25  ;;  %3860 = vst [vmem:[#allocation20_spill] sm:$0xff] %v2661_v30  ;;  %v3709_v34 = vand.u32 4294901760, %v2650_v25  ;;  %1818 = vmatprep.subr.mxu0 %v2619_v10  ;;  %v669_v38 = vsub.f32 %v2631_v18, %v3712_v29  ;;  %v3707_v39 = vand.u32 4294901760, %v2664_v31  ;;  %v2686_v40 = vsub.f32 %v317_v8, %v2621_v11  ;;  %v2719_v56 = vld [vmem:[#allocation7 + $0xb0] sm:$0xff]  ;;  %v2743_v2 = vld [vmem:[#allocation7 + $0xa8] sm:$0xff] }
  0x60   : > { %3861 = vst [vmem:[#allocation21_spill] sm:$0xff] %v2664_v31  ;;  %3862 = vst [vmem:[#allocation22_spill] sm:$0xff] %v2667_v32  ;;  %v2689_v41 = vand.u32 4294901760, %v2656_v28  ;;  %1819 = vmatpush3.msra.mxu0 %v2621_v11  ;;  %v557_v42 = vsub.f32 %v2644_v23, %v3710_v33  ;;  %v3705_v44 = vand.u32 4294901760, %v2673_v35  ;;  %v2700_v45 = vsub.f32 %v332_v12, %v2624_v15  ;;  %v2731_v61 = vld [vmem:[#allocation7 + $0x30] sm:$0xff]  ;;  %s1647_s24 = scalar_lea.sflag [#allocation4], %s2587_s28 }
  0x61   : > { %3863 = vst [vmem:[#allocation23_spill] sm:$0xff] %v2676_v36  ;;  %v676_v43 = vsub.f32 %v2650_v25, %v3709_v34  ;;  %1820 = vmatprep.subr.mxu0 %v2624_v15  ;;  %v670_v47 = vand.u32 4294901760, %v669_v38  ;;  %v564_v48 = vsub.f32 %v2664_v31, %v3707_v39  ;;  %v3704_v49 = vand.u32 4294901760, %v2686_v40  ;;  %v2834_v39 = vld [vmem:[#allocation7 + $0x90] sm:$0xff]  ;;  %s2332_s27 = scalar_lea.vmem %s3642_s4, 1024  ;;  %s2429_s15 = smov [#allocation8]  }
  0x62   : > { %3864 = vst [vmem:[#allocation24_spill] sm:$0xff] %v2689_v41  ;;  %3865 = vst [vmem:[#allocation25_spill] sm:$0xff] %v2700_v45  ;;  %v2710_v50 = vand.u32 4294901760, %v2678_v37  ;;  %1821 = vmatpush3.msra.mxu0 %v2626_v16  ;;  %v558_v52 = vand.u32 4294901760, %v557_v42  ;;  %v683_v54 = vsub.f32 %v2673_v35, %v3705_v44  ;;  %v3702_v55 = vand.u32 4294901760, %v2700_v45  ;;  %v2844_v34 = vld [vmem:[#allocation7 + $0x10] sm:$0xff]  ;;  %p2333_p1 = scmp.ne.s32.totalorder %s3642_s4, %s2332_s27 }
  0x63   : > { %v677_v53 = vand.u32 4294901760, %v676_v43  ;;  %1822 = vmatprep.subr.mxu0 %v2628_v17  ;;  %1870 = vmatprep.subr.mxu1 %v670_v47  ;;  %v565_v57 = vand.u32 4294901760, %v564_v48  ;;  %v571_v58 = vsub.f32 %v2686_v40, %v3704_v49  ;;  %v2726_v59 = vsub.f32 %v316_v13, %v2626_v16  ;;  %v2754_v13 = vld [vmem:[#allocation7 + $0x28] sm:$0xff]  ;;  %v2821_v49 = vld [vmem:[#allocation7 + $0x18] sm:$0xff]  ;;  %s2336_s10 = sshll.u32 %s2429_s15, 4  ;;  %s2337_s10 = int_to_ptr.vmem [resolvable:$false] %s2336_s10 }
  0x64   : > { %3866 = vst [vmem:[#allocation26_spill] sm:$0xff] %v2710_v50  ;;  %v2729_v60 = vand.u32 4294901760, %v2702_v46  ;;  %1823 = vmatpush3.msra.mxu0 %v2641_v22  ;;  %1871 = vmatpush3.msra.mxu1 %v558_v52  ;;  %v684_v62 = vand.u32 4294901760, %v683_v54  ;;  %v690_v63 = vsub.f32 %v2700_v45, %v3702_v55  ;;  %v2738_v0 = vsub.f32 %v331_v14, %v2628_v17  ;;  %p2334_p4 = pnand %p2333_p1, %p2538_p0  ;;  %s2338_s5 = scalar_lea.vmem %s2337_s10, 2048 }
  0x65   : > { %3867 = vst [vmem:[#allocation27_spill] sm:$0xff] %v2726_v59  ;;  %v2741_v1 = vand.u32 4294901760, %v2712_v51  ;;  %1824 = vmatprep.subr.mxu0 %v2647_v24  ;;  %1872 = vmatprep.subr.mxu1 %v677_v53  ;;  %v572_v6 = vand.u32 4294901760, %v571_v58  ;;  %v3700_v7 = vand.u32 4294901760, %v2726_v59  ;;  %v2749_v8 = vsub.f32 %v2633_v19, %v2641_v22  ;;  %p2339_p5 = scmp.lt.s32.totalorder %s3642_s4, %s2337_s10  ;;  %p2340_p7 = scmp.lt.s32.totalorder %s2338_s5, %s2332_s27 }
  0x66   : > { %3868 = vst [vmem:[#allocation28_spill] sm:$0xff] %v2729_v60  ;;  %v2752_v12 = vand.u32 4294901760, %v2719_v56  ;;  %1825 = vmatpush3.msra.mxu0 %v2661_v30  ;;  %1873 = vmatpush3.msra.mxu1 %v565_v57  ;;  %v691_v14 = vand.u32 4294901760, %v690_v63  ;;  %v3699_v38 = vand.u32 4294901760, %v2738_v0  ;;  %v2760_v42 = vsub.f32 %v2635_v20, %v2647_v24  ;;  %v2777_v20 = vld [vmem:[#allocation7 + $0xa0] sm:$0xff]  ;;  %p2335_p8 = pneg %p2334_p4 }
  0x67   : > { %3869 = vst [vmem:[#allocation29_spill] sm:$0xff] %v2741_v1  ;;  %v2763_v43 = vand.u32 4294901760, %v2731_v61  ;;  %1826 = vmatprep.subr.mxu0 %v2667_v32  ;;  %1874 = vmatprep.subr.mxu1 %v684_v62  ;;  %v578_v19 = vsub.f32 %v2726_v59, %v3700_v7  ;;  %v3701_v47 = vand.u32 4294901760, %v2749_v8  ;;  %v2772_v48 = vsub.f32 %v2637_v21, %v2661_v30  ;;  %v288_v30 = vld [vmem:[%s2601_s30] sm:$0xff]  ;;  %p2341_p2 = por %p2340_p7, %p2339_p5 }
  0x68   : > { %3870 = vst [vmem:[#allocation30_spill] sm:$0xff] %v2752_v12  ;;  %v2775_v52 = vand.u32 4294901760, %v2743_v2  ;;  %1827 = vmatpush3.msra.mxu0 %v2676_v36  ;;  %1875 = vmatpush3.msra.mxu1 %v572_v6  ;;  %v697_v53 = vsub.f32 %v2738_v0, %v3699_v38  ;;  %v3703_v54 = vand.u32 4294901760, %v2760_v42  ;;  %v2786_v57 = vsub.f32 %v2652_v26, %v2667_v32  ;;  %v2800_v38 = vld [vmem:[#allocation7 + $0x20] sm:$0xff] }
  0x69   : > { %3871 = vst [vmem:[#allocation31_spill] sm:$0xff] %v2763_v43  ;;  %v2789_v21 = vand.u32 4294901760, %v2754_v13  ;;  %1828 = vmatprep.subr.mxu0 %v2689_v41  ;;  %1876 = vmatprep.subr.mxu1 %v691_v14  ;;  %v579_v58 = vand.u32 4294901760, %v578_v19  ;;  %v585_v62 = vsub.f32 %v2749_v8, %v3701_v47  ;;  %v3706_v63 = vand.u32 4294901760, %v2772_v48  ;;  %v2810_v47 = vld [vmem:[#allocation7 + $0x98] sm:$0xff]  ;;  %p2342_p6 = pnand %p2341_p2, %p2335_p8 }
  0x6a   : > { %3872 = vst [vmem:[#allocation32_spill] sm:$0xff] %v2775_v52  ;;  %v2798_v6 = vsub.f32 %v2654_v27, %v2676_v36  ;;  %1829 = vmatpush3.msra.mxu0 %v2710_v50  ;;  %v698_v26 = vand.u32 4294901760, %v697_v53  ;;  %v704_v14 = vsub.f32 %v2760_v42, %v3703_v54  ;;  %v3708_v19 = vand.u32 4294901760, %v2786_v57 }
  0x6b   : > { %3873 = vst [vmem:[#allocation33_spill] sm:$0xff] %v2789_v21  ;;  %v2808_v7 = vand.u32 4294901760, %v2777_v20  ;;  %1877 = vmatpush3.msra.mxu1 %v579_v58  ;;  %1830 = vmatprep.subr.mxu0 %v2729_v60  ;;  %v586_v27 = vand.u32 4294901760, %v585_v62  ;;  %v592_v55 = vsub.f32 %v2772_v48, %v3706_v63  ;;  %v2819_v54 = vsub.f32 %v2656_v28, %v2689_v41 }
  0x6c   : > { %v3711_v53 = vand.u32 4294901760, %v2798_v6  ;;  %1878 = vmatprep.subr.mxu1 %v698_v26  ;;  %1831 = vmatpush3.msra.mxu0 %v2741_v1  ;;  %v705_v44 = vand.u32 4294901760, %v704_v14  ;;  %v711_v58 = vsub.f32 %v2786_v57, %v3708_v19  ;;  %v2828_v62 = vand.u32 4294901760, %v2800_v38 }
  0x6d   : > { %3874 = vst [vmem:[#allocation34_spill] sm:$0xff] %v2808_v7  ;;  %v2832_v63 = vsub.f32 %v2678_v37, %v2710_v50  ;;  %1879 = vmatpush3.msra.mxu1 %v586_v27  ;;  %1832 = vmatprep.subr.mxu0 %v2752_v12  ;;  %v593_v28 = vand.u32 4294901760, %v592_v55  ;;  %v3715_v14 = vand.u32 4294901760, %v2819_v54  ;;  %v2842_v19 = vand.u32 4294901760, %v2810_v47 }
  0x6e   : > { %3875 = vst [vmem:[#allocation35_spill] sm:$0xff] %v2828_v62  ;;  %v599_v26 = vsub.f32 %v2798_v6, %v3711_v53  ;;  %1880 = vmatprep.subr.mxu1 %v705_v44  ;;  %1833 = vmatpush3.msra.mxu0 %v2763_v43  ;;  %v712_v37 = vand.u32 4294901760, %v711_v58  ;;  %v2850_v55 = vsub.f32 %v2702_v46, %v2729_v60  ;;  %v2853_v33 = vand.u32 4294901760, %v2821_v49  ;;  %v2855_v53 = vld [vmem:[#allocation7 + $0x88] sm:$0xff] }
  0x6f   : > { %3876 = vst [vmem:[#allocation36_spill] sm:$0xff] %v2842_v19  ;;  %v3718_v27 = vand.u32 4294901760, %v2832_v63  ;;  %1881 = vmatpush3.msra.mxu1 %v593_v28  ;;  %1834 = vmatprep.subr.mxu0 %v2775_v52  ;;  %v718_v44 = vsub.f32 %v2819_v54, %v3715_v14  ;;  %v2863_v58 = vsub.f32 %v2712_v51, %v2741_v1  ;;  %v2866_v46 = vand.u32 4294901760, %v2834_v39  ;;  %v2880_v51 = vld [vmem:[#allocation7 + $0x8] sm:$0xff] }
  0x70   : > { %3877 = vst [vmem:[#allocation37_spill] sm:$0xff] %v2853_v33  ;;  %v600_v29 = vand.u32 4294901760, %v599_v26  ;;  %1882 = vmatprep.subr.mxu1 %v712_v37  ;;  %1835 = vmatpush3.msra.mxu0 %v2789_v21  ;;  %v2875_v60 = vsub.f32 %v2719_v56, %v2752_v12  ;;  %v2878_v14 = vand.u32 4294901760, %v2844_v34  ;;  %v2889_v26 = vand.u32 4294901760, %v2855_v53  ;;  %v2891_v56 = vld [vmem:[#allocation7 + $0x80] sm:$0xff] }
  0x71   : > { %3878 = vst [vmem:[#allocation38_spill] sm:$0xff] %v2866_v46  ;;  %v606_v28 = vsub.f32 %v2832_v63, %v3718_v27  ;;  %1836 = vmatprep.subr.mxu0 %v2808_v7  ;;  %v719_v37 = vand.u32 4294901760, %v718_v44  ;;  %v2886_v27 = vsub.f32 %v2731_v61, %v2763_v43  ;;  %v2900_v1 = vsub.f32 %v2743_v2, %v2775_v52  ;;  %v2914_v44 = vld [vmem:[#allocation7] sm:$0xff]  ;;  %v289_v2 = vld [vmem:[%s2601_s30 + $0x8] sm:$0xff] }
  0x72   : > { %3879 = vst [vmem:[#allocation39_spill] sm:$0xff] %v2878_v14  ;;  %1883 = vmatpush3.msra.mxu1 %v600_v29  ;;  %3880 = vst [vmem:[#allocation40_spill] sm:$0xff] %v2889_v26  ;;  %1837 = vmatpush3.msra.mxu0 %v2828_v62  ;;  %v3881_v29 = vand.u32 4294901760, %v2850_v55  ;;  %v3883_v61 = vand.u32 4294901760, %v2863_v58  ;;  %v3885_v52 = vand.u32 4294901760, %v2875_v60  ;;  %v2923_v36 = vand.u32 4294901760, %v2891_v56 }
  0x73   : > { %v607_v12 = vand.u32 4294901760, %v606_v28  ;;  %3882 = vst [vmem:[#allocation41_spill] sm:$0xff] %v2900_v1  ;;  %1884 = vmatprep.subr.mxu1 %v719_v37  ;;  %1838 = vmatprep.subr.mxu0 %v2842_v19  ;;  %v2908_v28 = vand.u32 4294901760, %v2880_v51  ;;  %v3741_v41 = vand.u32 4294901760, %v2900_v1  ;;  %v2940_v24 = vand.u32 4294901760, %v2914_v44 }
  0x74   : > { %v725_v50 = vsub.f32 %v2850_v55, %v3881_v29  ;;  %v613_v43 = vsub.f32 %v2863_v58, %v3883_v61  ;;  %v2912_v29 = vsub.f32 %v2754_v13, %v2789_v21  ;;  %1839 = vmatpush3.msra.mxu0 %v2853_v33  ;;  %v732_v61 = vsub.f32 %v2875_v60, %v3885_v52 }
  0x75   : > { %3884 = vst [vmem:[#allocation42_spill] sm:$0xff] %v2908_v28  ;;  %1885 = vmatpush3.msra.mxu1 %v607_v12  ;;  %3886 = vst [vmem:[#allocation43_spill] sm:$0xff] %v2923_v36  ;;  %1840 = vmatprep.subr.mxu0 %v2866_v46  ;;  %v3887_v13 = vand.u32 4294901760, %v2886_v27  ;;  %v2932_v12 = vsub.f32 %v2777_v20, %v2808_v7  ;;  %v2951_v7 = vsub.f32 %v2800_v38, %v2828_v62 }
  0x76   : > { %v726_v37 = vand.u32 4294901760, %v725_v50  ;;  %v614_v32 = vand.u32 4294901760, %v613_v43  ;;  %v733_v52 = vand.u32 4294901760, %v732_v61  ;;  %1841 = vmatpush3.msra.mxu0 %v2878_v14  ;;  %v739_v43 = vsub.f32 %v2900_v1, %v3741_v41  ;;  %3888 = vst [vmem:[#allocation44_spill] sm:$0xff] %v2940_v24 }
  0x77   : > { %v620_v21 = vsub.f32 %v2886_v27, %v3887_v13  ;;  %v2942_v13 = vand.u32 4294901760, %v289_v2  ;;  %1842 = vmatprep.subr.mxu0 %v2889_v26  ;;  %v3890_v20 = vand.u32 4294901760, %v2912_v29  ;;  %v3893_v38 = vand.u32 4294901760, %v2932_v12 }
  0x78   : > { %1886 = vmatprep.subr.mxu1 %v726_v37  ;;  %v740_v41 = vand.u32 4294901760, %v739_v43  ;;  %1843 = vmatpush3.msra.mxu0 %v2908_v28 }
  0x79   : > { %3889 = vst [vmem:[#allocation45_spill] sm:$0xff] %v2942_v13  ;;  %1887 = vmatpush3.msra.mxu1 %v614_v32  ;;  %v621_v50 = vand.u32 4294901760, %v620_v21  ;;  %v627_v37 = vsub.f32 %v2912_v29, %v3890_v20  ;;  %v2955_v1 = vsub.f32 %v289_v2, %v2942_v13  ;;  %v2957_v32 = vand.u32 4294901760, %v288_v30  ;;  %v291_v20 = vld [vmem:[%s2601_s30 + $0x18] sm:$0xff]  ;;  %1844 = vmatprep.subr.mxu0 %v2923_v36 }
  0x7a   : > { %1888 = vmatprep.subr.mxu1 %v733_v52  ;;  %v2961_v21 = vsub.f32 %v2810_v47, %v2842_v19  ;;  %v746_v52 = vsub.f32 %v2932_v12, %v3893_v38  ;;  %v2971_v2 = vsub.f32 %v2821_v49, %v2853_v33  ;;  %1845 = vmatpush3.msra.mxu0 %v2940_v24  ;;  %v3895_v49 = vand.u32 4294901760, %v2951_v7 }
  0x7b   : > { %3891 = vst [vmem:[#allocation46_spill] sm:$0xff] %v2955_v1  ;;  %3892 = vst [vmem:[#allocation47_spill] sm:$0xff] %v2957_v32  ;;  %1889 = vmatpush3.msra.mxu1 %v621_v50  ;;  %v628_v61 = vand.u32 4294901760, %v627_v37  ;;  %v2976_v50 = vsub.f32 %v288_v30, %v2957_v32  ;;  %v2981_v38 = vsub.f32 %v2834_v39, %v2866_v46  ;;  %1926 = vmatprep.subr.mxu0 %v2631_v18  ;;  %v290_v46 = vld [vmem:[%s2601_s30 + $0x10] sm:$0xff] }
  0x7c   : > { %3894 = vst [vmem:[#allocation48_spill] sm:$0xff] %v2971_v2  ;;  %1890 = vmatprep.subr.mxu1 %v740_v41  ;;  %v747_v43 = vand.u32 4294901760, %v746_v52  ;;  %v634_v41 = vsub.f32 %v2951_v7, %v3895_v49  ;;  %v3757_v33 = vand.u32 4294901760, %v2971_v2  ;;  %v2988_v47 = vand.u32 4294901760, %v291_v20  ;;  %778 = vmatprep.mubr.f32.mxu1 %v2942_v13 }
  0x7d   : > { %1891 = vmatpush3.msra.mxu1 %v628_v61  ;;  %v3897_v30 = vand.u32 4294901760, %v2955_v1  ;;  %v3898_v39 = vand.u32 4294901760, %v2961_v21  ;;  %v3008_v19 = vsub.f32 %v2844_v34, %v2878_v14  ;;  %v3900_v52 = vand.u32 4294901760, %v2976_v50  ;;  %v293_v34 = vld [vmem:[%s2601_s30 + $0x28] sm:$0xff]  ;;  %v299_v14 = vld [vmem:[%s2601_s30 + $0x58] sm:$0xff] }
  0x7e   : > { %3896 = vst [vmem:[#allocation49_spill] sm:$0xff] %v2988_v47  ;;  %1892 = vmatprep.subr.mxu1 %v747_v43  ;;  %v635_v49 = vand.u32 4294901760, %v634_v41  ;;  %v641_v18 = vsub.f32 %v2971_v2, %v3757_v33  ;;  %v3901_v43 = vand.u32 4294901760, %v2981_v38  ;;  %v3018_v2 = vand.u32 4294901760, %v290_v46 }
  0x7f   : > { %v435_v37 = vsub.f32 %v2955_v1, %v3897_v30  ;;  %v753_v61 = vsub.f32 %v2961_v21, %v3898_v39  ;;  %v3004_v30 = vsub.f32 %v291_v20, %v2988_v47  ;;  %v441_v62 = vsub.f32 %v2976_v50, %v3900_v52 }
  0x80   : > { %v760_v41 = vsub.f32 %v2981_v38, %v3901_v43  ;;  %1893 = vmatpush3.msra.mxu1 %v635_v49  ;;  %v642_v13 = vand.u32 4294901760, %v641_v18  ;;  %v3760_v20 = vand.u32 4294901760, %v3008_v19  ;;  %3902 = vst [vmem:[#allocation51_spill] sm:$0xff] %v3018_v2  ;;  %v3027_v18 = vsub.f32 %v2880_v51, %v2908_v28  ;;  %v297_v28 = vld [vmem:[%s2601_s30 + $0x48] sm:$0xff] }
  0x81   : > { %3899 = vst [vmem:[#allocation50_spill] sm:$0xff] %v3004_v30  ;;  %v436_v39 = vand.u32 4294901760, %v435_v37  ;;  %v754_v1 = vand.u32 4294901760, %v753_v61  ;;  %v3761_v33 = vand.u32 4294901760, %v3004_v30  ;;  %v442_v37 = vand.u32 4294901760, %v441_v62 }
  0x82   : > { %v761_v52 = vand.u32 4294901760, %v760_v41  ;;  %v3023_v61 = vsub.f32 %v2855_v53, %v2889_v26  ;;  %3903 = vst [vmem:[#allocation52_spill] sm:$0xff] %v3027_v18  ;;  %v648_v62 = vsub.f32 %v3008_v19, %v3760_v20  ;;  %v3040_v53 = vsub.f32 %v2891_v56, %v2923_v36  ;;  %v292_v41 = vld [vmem:[%s2601_s30 + $0x20] sm:$0xff]  ;;  %v295_v20 = vld [vmem:[%s2601_s30 + $0x38] sm:$0xff] }
  0x83   : > { %437 = vmatprep.mubr.f32.mxu0 %v436_v39  ;;  %1894 = vmatprep.subr.mxu1 %v754_v1  ;;  %v450_v49 = vsub.f32 %v3004_v30, %v3761_v33  ;;  %v3036_v1 = vsub.f32 %v290_v46, %v3018_v2  ;;  %v3044_v39 = vand.u32 4294901760, %v293_v34  ;;  %v3048_v43 = vsub.f32 %v2914_v44, %v2940_v24 }
  0x84   : > { %1895 = vmatpush3.msra.mxu1 %v642_v13  ;;  %3905 = vst [vmem:[#allocation54_spill] sm:$0xff] %v3040_v53  ;;  %443 = vmatmul.mubr.f32.vlgmr.msra.gmra.mxu0 %v442_v37  ;;  %v3764_v51 = vand.u32 4294901760, %v3023_v61  ;;  %v3767_v13 = vand.u32 4294901760, %v3027_v18  ;;  %v649_v56 = vand.u32 4294901760, %v648_v62  ;;  %v3072_v36 = vand.u32 4294901760, %v292_v41 }
  0x85   : > { %3904 = vst [vmem:[#allocation53_spill] sm:$0xff] %v3036_v1  ;;  %1896 = vmatprep.subr.mxu1 %v761_v52  ;;  %3906 = vst [vmem:[#allocation55_spill] sm:$0xff] %v3044_v39  ;;  %1927 = vmatpush3.msra.mxu0 %v2644_v23  ;;  %v451_v46 = vand.u32 4294901760, %v450_v49  ;;  %v3772_v37 = vand.u32 4294901760, %v3036_v1  ;;  %v3777_v52 = vand.u32 4294901760, %v3040_v53  ;;  %v3063_v24 = vsub.f32 %v293_v34, %v3044_v39  ;;  %v294_v34 = vld [vmem:[%s2601_s30 + $0x30] sm:$0xff] }
  0x86   : > { %3907 = vst [vmem:[#allocation56_spill] sm:$0xff] %v3048_v43  ;;  %1928 = vmatprep.subr.mxu0 %v2650_v25  ;;  %v767_v33 = vsub.f32 %v3023_v61, %v3764_v51  ;;  %v655_v44 = vsub.f32 %v3027_v18, %v3767_v13  ;;  %1897 = vmatpush3.msra.mxu1 %v649_v56  ;;  %3909 = vst [vmem:[#allocation58_spill] sm:$0xff] %v3072_v36  ;;  %v3074_v13 = vand.u32 4294901760, %v295_v20 }
  0x87   : > { %3908 = vst [vmem:[#allocation57_spill] sm:$0xff] %v3063_v24  ;;  %452 = vmatprep.mubr.f32.mxu0 %v451_v46  ;;  %v456_v62 = vsub.f32 %v3036_v1, %v3772_v37  ;;  %v774_v51 = vsub.f32 %v3040_v53, %v3777_v52  ;;  %1929 = vmatpush3.msra.mxu0 %v2664_v31  ;;  %v3783_v56 = vand.u32 4294901760, %v3063_v24  ;;  %v3911_v26 = vand.u32 4294901760, %v3048_v43  ;;  %v296_v1 = vld [vmem:[%s2601_s30 + $0x40] sm:$0xff] }
  0x88   : > { %3910 = vst [vmem:[#allocation59_spill] sm:$0xff] %v3074_v13  ;;  %v768_v49 = vand.u32 4294901760, %v767_v33  ;;  %v656_v46 = vand.u32 4294901760, %v655_v44  ;;  %1930 = vmatprep.subr.mxu0 %v2673_v35  ;;  %v3087_v25 = vsub.f32 %v292_v41, %v3072_v36  ;;  %v3090_v23 = vsub.f32 %v295_v20, %v3074_v13  ;;  %v298_v33 = vld [vmem:[%s2601_s30 + $0x50] sm:$0xff] }
  0x89   : > { %v662_v37 = vsub.f32 %v3048_v43, %v3911_v26  ;;  %v457_v52 = vand.u32 4294901760, %v456_v62  ;;  %v775_v30 = vand.u32 4294901760, %v774_v51  ;;  %1931 = vmatpush3.msra.mxu0 %v2686_v40  ;;  %v465_v26 = vsub.f32 %v3063_v24, %v3783_v56 }
  0x8a   : > { %1898 = vmatprep.subr.mxu1 %v768_v49  ;;  %v3097_v31 = vand.u32 4294901760, %v294_v34  ;;  %v3099_v62 = vand.u32 4294901760, %v297_v28  ;;  %v3789_v51 = vand.u32 4294901760, %v3087_v25  ;;  %v3788_v20 = vand.u32 4294901760, %v3090_v23  ;;  %1932 = vmatprep.subr.mxu0 %v2700_v45 }
  0x8b   : > { %v663_v44 = vand.u32 4294901760, %v662_v37  ;;  %458 = vmatmul.mubr.f32.gmra.mxu0 %v457_v52  ;;  %1899 = vmatpush3.msra.mxu1 %v656_v46  ;;  %v3103_v41 = vand.u32 4294901760, %v296_v1  ;;  %v3105_v49 = vand.u32 4294901760, %v299_v14  ;;  %v466_v56 = vand.u32 4294901760, %v465_v26  ;;  %v301_v26 = vld [vmem:[%s2601_s30 + $0x68] sm:$0xff] }
  0x8c   : > { %3912 = vst [vmem:[#allocation60_spill] sm:$0xff] %v3097_v31  ;;  %3913 = vst [vmem:[#allocation61_spill] sm:$0xff] %v3099_v62  ;;  %1900 = vmatprep.subr.mxu1 %v775_v30  ;;  %v3109_v37 = vsub.f32 %v294_v34, %v3097_v31  ;;  %v3112_v24 = vsub.f32 %v297_v28, %v3099_v62  ;;  %v3114_v52 = vand.u32 4294901760, %v298_v33  ;;  %1933 = vmatpush3.msra.mxu0 %v2726_v59 }
  0x8d   : > { %3914 = vst [vmem:[#allocation62_spill] sm:$0xff] %v3103_v41  ;;  %3915 = vst [vmem:[#allocation63_spill] sm:$0xff] %v3105_v49  ;;  %1901 = vmatpush3.msra.mxu1 %v663_v44  ;;  %v471_v46 = vsub.f32 %v3087_v25, %v3789_v51  ;;  %v480_v30 = vsub.f32 %v3090_v23, %v3788_v20  ;;  %v3124_v34 = vsub.f32 %v296_v1, %v3103_v41  ;;  %v300_v51 = vld [vmem:[%s2601_s30 + $0x60] sm:$0xff] }
  0x8e   : > { %3916 = vst [vmem:[#allocation64_spill] sm:$0xff] %v3109_v37  ;;  %3917 = vst [vmem:[#allocation65_spill] sm:$0xff] %v3114_v52  ;;  %467 = vmatprep.mubr.f32.mxu0 %v466_v56  ;;  %780 = vmatmul.mubr.f32.vlgmr.msra.gmra.mxu1 %v2957_v32  ;;  %v3792_v28 = vand.u32 4294901760, %v3109_v37  ;;  %v3795_v44 = vand.u32 4294901760, %v3112_v24  ;;  %v3131_v59 = vsub.f32 %v299_v14, %v3105_v49 }
  0x8f   : > { %3918 = vst [vmem:[#allocation66_spill] sm:$0xff] %v3124_v34  ;;  %v472_v45 = vand.u32 4294901760, %v471_v46  ;;  %1934 = vmatprep.subr.mxu0 %v2738_v0  ;;  %1982 = vmatprep.subr.mxu1 %v2611_v3  ;;  %v481_v20 = vand.u32 4294901760, %v480_v30  ;;  %v3146_v46 = vsub.f32 %v298_v33, %v3114_v52  ;;  %v3148_v30 = vand.u32 4294901760, %v301_v26 }
  0x90   : > { %1935 = vmatpush3.msra.mxu0 %v2749_v8  ;;  %1983 = vmatpush3.msra.mxu1 %v2613_v4  ;;  %v486_v56 = vsub.f32 %v3109_v37, %v3792_v28  ;;  %v495_v14 = vsub.f32 %v3112_v24, %v3795_v44  ;;  %v3920_v32 = vand.u32 4294901760, %v3124_v34  ;;  %v3156_v44 = vand.u32 4294901760, %v300_v51 }
  0x91   : > { %3919 = vst [vmem:[#allocation67_spill] sm:$0xff] %v3148_v30  ;;  %473 = vmatmul.mubr.f32.gmra.mxu0 %v472_v45  ;;  %1936 = vmatprep.subr.mxu0 %v2760_v42  ;;  %v303_v45 = vld [vmem:[%s2601_s30 + $0x78] sm:$0xff] }
  0x92   : > { %1984 = vmatprep.subr.mxu1 %v2615_v5  ;;  %482 = vmatprep.mubr.f32.mxu0 %v481_v20  ;;  %v487_v1 = vand.u32 4294901760, %v486_v56  ;;  %v501_v28 = vsub.f32 %v3124_v34, %v3920_v32  ;;  %3921 = vst [vmem:[#allocation68_spill] sm:$0xff] %v3156_v44  ;;  %v496_v33 = vand.u32 4294901760, %v495_v14  ;;  %v3165_v56 = vsub.f32 %v301_v26, %v3148_v30  ;;  %v302_v32 = vld [vmem:[%s2601_s30 + $0x70] sm:$0xff] }
  0x93   : > { %785 = vmatprep.mubr.f32.mxu1 %v2988_v47  ;;  %1937 = vmatpush3.msra.mxu0 %v2772_v48  ;;  %v3923_v47 = vand.u32 4294901760, %v3131_v59  ;;  %v3175_v14 = vsub.f32 %v300_v51, %v3156_v44  ;;  %v3177_v20 = vand.u32 4294901760, %v303_v45  ;;  %v3926_v26 = vand.u32 4294901760, %v3146_v46 }
  0x94   : > { %1985 = vmatpush3.msra.mxu1 %v2617_v9  ;;  %1938 = vmatprep.subr.mxu0 %v2786_v57  ;;  %3922 = vst [vmem:[#allocation69_spill] sm:$0xff] %v3165_v56  ;;  %v502_v37 = vand.u32 4294901760, %v501_v28 }
  0x95   : > { %488 = vmatmul.mubr.f32.gmra.mxu0 %v487_v1  ;;  %787 = vmatmul.mubr.f32.gmra.mxu1 %v3018_v2  ;;  %v510_v34 = vsub.f32 %v3131_v59, %v3923_v47  ;;  %3924 = vst [vmem:[#allocation70_spill] sm:$0xff] %v3175_v14  ;;  %3925 = vst [vmem:[#allocation71_spill] sm:$0xff] %v3177_v20  ;;  %v516_v28 = vsub.f32 %v3146_v46, %v3926_v26  ;;  %v3804_v1 = vand.u32 4294901760, %v3165_v56 }
  0x96   : > { %1986 = vmatprep.subr.mxu1 %v2619_v10  ;;  %1939 = vmatpush3.msra.mxu0 %v2798_v6  ;;  %v3186_v2 = vand.u32 4294901760, %v302_v32  ;;  %v3809_v51 = vand.u32 4294901760, %v3175_v14 }
  0x97   : > { %1987 = vmatpush3.msra.mxu1 %v2621_v11  ;;  %1940 = vmatprep.subr.mxu0 %v2819_v54  ;;  %v511_v47 = vand.u32 4294901760, %v510_v34  ;;  %v517_v26 = vand.u32 4294901760, %v516_v28  ;;  %v3929_v34 = vld [vmem:[#allocation18_spill] sm:$0xff] }
  0x98   : > { %1988 = vmatprep.subr.mxu1 %v2624_v15  ;;  %497 = vmatprep.mubr.f32.mxu0 %v496_v33  ;;  %3927 = vst [vmem:[#allocation72_spill] sm:$0xff] %v3186_v2  ;;  %v3193_v33 = vsub.f32 %v303_v45, %v3177_v20  ;;  %v531_v45 = vsub.f32 %v3175_v14, %v3809_v51  ;;  %v3933_v14 = vld [vmem:[#allocation23_spill] sm:$0xff] }
  0x99   : > { %792 = vmatprep.mubr.f32.mxu1 %v3044_v39  ;;  %1941 = vmatpush3.msra.mxu0 %v2832_v63  ;;  %v525_v39 = vsub.f32 %v3165_v56, %v3804_v1  ;;  %v3930_v1 = vld [vmem:[#allocation20_spill] sm:$0xff]  ;;  %v3931_v56 = vld [vmem:[#allocation41_spill] sm:$0xff] }
  0x9a   : > { %1989 = vmatpush3.msra.mxu1 %v2626_v16  ;;  %503 = vmatmul.mubr.f32.gmra.mxu0 %v502_v37  ;;  %3928 = vst [vmem:[#allocation73_spill] sm:$0xff] %v3193_v33  ;;  %v3203_v37 = vsub.f32 %v302_v32, %v3186_v2  ;;  %v3816_v28 = vand.u32 4294901760, %v3193_v33  ;;  %v532_v51 = vand.u32 4294901760, %v531_v45  ;;  %v3935_v45 = vld [vmem:[#allocation26_spill] sm:$0xff] }
  0x9b   : > { %794 = vmatmul.mubr.f32.gmra.mxu1 %v3072_v36  ;;  %1942 = vmatprep.subr.mxu0 %v2850_v55  ;;  %v526_v32 = vand.u32 4294901760, %v525_v39  ;;  %v3934_v39 = vld [vmem:[#allocation24_spill] sm:$0xff] }
  0x9c   : > { %1990 = vmatprep.subr.mxu1 %v2628_v17  ;;  %1943 = vmatpush3.msra.mxu0 %v2863_v58  ;;  %v3819_v36 = vand.u32 4294901760, %v3203_v37 }
  0x9d   : > { %1991 = vmatpush3.msra.mxu1 %v2641_v22  ;;  %1944 = vmatprep.subr.mxu0 %v2875_v60 }
  0x9e   : > { %1992 = vmatprep.subr.mxu1 %v3929_v34  ;;  %512 = vmatprep.mubr.f32.mxu0 %v511_v47  ;;  %v3932_v47 = vld [vmem:[#allocation22_spill] sm:$0xff] }
  0x9f   : > { %799 = vmatprep.mubr.f32.mxu1 %v3074_v13  ;;  %1945 = vmatpush3.msra.mxu0 %v2886_v27  ;;  %v540_v13 = vsub.f32 %v3193_v33, %v3816_v28  ;;  %v3936_v28 = vld [vmem:[#allocation28_spill] sm:$0xff] }
  0xa0   : > { %1993 = vmatpush3.msra.mxu1 %v3930_v1  ;;  %518 = vmatmul.mubr.f32.gmra.mxu0 %v517_v26  ;;  %v546_v26 = vsub.f32 %v3203_v37, %v3819_v36  ;;  %v3937_v33 = vld [vmem:[#allocation48_spill] sm:$0xff]  ;;  %v3939_v36 = vld [vmem:[#allocation30_spill] sm:$0xff] }
  0xa1   : > { %801 = vmatmul.mubr.f32.gmra.mxu1 %v3097_v31  ;;  %1946 = vmatprep.subr.mxu0 %v3931_v56  ;;  %v541_v31 = vand.u32 4294901760, %v540_v13  ;;  %v3940_v13 = vld [vmem:[#allocation31_spill] sm:$0xff] }
  0xa2   : > { %1994 = vmatprep.subr.mxu1 %v3932_v47  ;;  %1947 = vmatpush3.msra.mxu0 %v2912_v29 }
  0xa3   : > { %1995 = vmatpush3.msra.mxu1 %v3933_v14  ;;  %1948 = vmatprep.subr.mxu0 %v2932_v12 }
  0xa4   : > { %1996 = vmatprep.subr.mxu1 %v3934_v39  ;;  %527 = vmatprep.mubr.f32.mxu0 %v526_v32  ;;  %v547_v32 = vand.u32 4294901760, %v546_v26  ;;  %v3938_v39 = vld [vmem:[#allocation29_spill] sm:$0xff] }
  0xa5   : > { %806 = vmatprep.mubr.f32.mxu1 %v3099_v62  ;;  %1949 = vmatpush3.msra.mxu0 %v2951_v7  ;;  %v3942_v26 = vld [vmem:[#allocation33_spill] sm:$0xff] }
  0xa6   : > { %1997 = vmatpush3.msra.mxu1 %v3935_v45  ;;  %533 = vmatmul.mubr.f32.gmra.mxu0 %v532_v51  ;;  %v3941_v51 = vld [vmem:[#allocation32_spill] sm:$0xff] }
  0xa7   : > { %808 = vmatmul.mubr.f32.gmra.mxu1 %v3103_v41  ;;  %1950 = vmatprep.subr.mxu0 %v2961_v21  ;;  %v3947_v41 = vld [vmem:[#allocation16_spill] sm:$0xff] }
  0xa8   : > { %1998 = vmatprep.subr.mxu1 %v3936_v28  ;;  %1951 = vmatpush3.msra.mxu0 %v3937_v33  ;;  %v3948_v62 = vand.u32 4294901760, %v3947_v41  ;;  %v3960_v41 = vld [vmem:[#allocation40_spill] sm:$0xff] }
  0xa9   : > { %1999 = vmatpush3.msra.mxu1 %v3938_v39  ;;  %1952 = vmatprep.subr.mxu0 %v2981_v38 }
  0xaa   : > { %2000 = vmatprep.subr.mxu1 %v3939_v36  ;;  %542 = vmatprep.mubr.f32.mxu0 %v541_v31  ;;  %v3943_v31 = vld [vmem:[#allocation34_spill] sm:$0xff] }
  0xab   : > { %813 = vmatprep.mubr.f32.mxu1 %v3105_v49  ;;  %1953 = vmatpush3.msra.mxu0 %v3008_v19  ;;  %v3944_v49 = vld [vmem:[#allocation46_spill] sm:$0xff] }
  0xac   : > { %2001 = vmatpush3.msra.mxu1 %v3940_v13  ;;  %548 = vmatmul.mubr.f32.gmra.mxu0 %v547_v32  ;;  %v3945_v32 = vld [vmem:[#allocation35_spill] sm:$0xff] }
  0xad   : > { %815 = vmatmul.mubr.f32.gmra.mxu1 %v3114_v52  ;;  %1954 = vmatprep.subr.mxu0 %v3023_v61  ;;  %v3946_v52 = vld [vmem:[#allocation36_spill] sm:$0xff] }
  0xae   : > { %2002 = vmatprep.subr.mxu1 %v3941_v51  ;;  %1955 = vmatpush3.msra.mxu0 %v3027_v18 }
  0xaf   : > { %2003 = vmatpush3.msra.mxu1 %v3942_v26  ;;  %1956 = vmatprep.subr.mxu0 %v3040_v53  ;;  %v3949_v53 = vld [vmem:[#allocation37_spill] sm:$0xff] }
  0xb0   : > { %2004 = vmatprep.subr.mxu1 %v3943_v31  ;;  %820 = vmatprep.mubr.f32.mxu1 %v3148_v30  ;;  %v3950_v31 = vld [vmem:[#allocation17_spill] sm:$0xff]  ;;  %v3952_v30 = vld [vmem:[#allocation38_spill] sm:$0xff] }
  0xb1   : > { %1957 = vmatpush3.msra.mxu0 %v3048_v43  ;;  %964 = vmatprep.mubr.f32.mxu0 %v3944_v49  ;;  %v3951_v26 = vand.u32 4294901760, %v3950_v31  ;;  %v3953_v43 = vld [vmem:[#allocation19_spill] sm:$0xff] }
  0xb2   : > { %2005 = vmatpush3.msra.mxu1 %v3945_v32  ;;  %967 = vmatmul.mubr.f32.vlgmr.msra.gmra.mxu0 %v2976_v50  ;;  %v3954_v18 = vand.u32 4294901760, %v3953_v43  ;;  %v3955_v32 = vld [vmem:[#allocation50_spill] sm:$0xff]  ;;  %v3964_v31 = vld [vmem:[#allocation43_spill] sm:$0xff] }
  0xb3   : > { %822 = vmatmul.mubr.f32.gmra.mxu1 %v3156_v44  ;;  %2006 = vmatprep.subr.mxu1 %v3946_v52  ;;  %v3956_v44 = vld [vmem:[#allocation39_spill] sm:$0xff]  ;;  %v3957_v52 = vld [vmem:[#allocation21_spill] sm:$0xff]  ;;  %v3962_v43 = vld [vmem:[#allocation42_spill] sm:$0xff] }
  0xb4   : > { %2038 = vmatprep.subr.mxu0 %v3948_v62  ;;  %2007 = vmatpush3.msra.mxu1 %v3949_v53  ;;  %v3958_v51 = vand.u32 4294901760, %v3957_v52  ;;  %v3959_v62 = vld [vmem:[#allocation53_spill] sm:$0xff] }
  0xb5   : > { %2039 = vmatpush3.msra.mxu0 %v3951_v26  ;;  %2008 = vmatprep.subr.mxu1 %v3952_v30  ;;  %v3961_v26 = vand.u32 4294901760, %v2673_v35  ;;  %v3967_v52 = vld [vmem:[#allocation57_spill] sm:$0xff] }
  0xb6   : > { %2040 = vmatprep.subr.mxu0 %v3954_v18  ;;  %827 = vmatprep.mubr.f32.mxu1 %v3177_v20  ;;  %v3963_v18 = vand.u32 4294901760, %v2686_v40  ;;  %v3965_v20 = vld [vmem:[#allocation25_spill] sm:$0xff]  ;;  %v3973_v40 = vand.u32 4294901760, %v2738_v0  ;;  %v3977_v0 = vand.u32 4294901760, %v2772_v48  ;;  %v3984_v48 = vand.u32 4294901760, %v2832_v63  ;;  %v3996_v63 = vld [vmem:[#allocation24_spill] sm:$0xff] }
  0xb7   : > { %973 = vmatprep.mubr.f32.mxu0 %v3955_v32  ;;  %2009 = vmatpush3.msra.mxu1 %v3956_v44  ;;  %v3966_v44 = vand.u32 4294901760, %v3965_v20  ;;  %v4006_v20 = vand.u32 4294901760, %v3131_v59 }
  0xb8   : > { %2041 = vmatpush3.msra.mxu0 %v3958_v51  ;;  %829 = vmatmul.mubr.f32.gmra.mxu1 %v3186_v2  ;;  %v3968_v51 = vld [vmem:[#allocation44_spill] sm:$0xff]  ;;  %v3969_v2 = vand.u32 4294901760, %v3944_v49  ;;  %v4003_v49 = vand.u32 4294901760, %v3937_v33  ;;  %v4014_v33 = vld [vmem:[#allocation54_spill] sm:$0xff] }
  0xb9   : > { %976 = vmatmul.mubr.f32.gmra.mxu0 %v3959_v62  ;;  %2010 = vmatprep.subr.mxu1 %v3960_v41  ;;  %v3970_v41 = vld [vmem:[#allocation27_spill] sm:$0xff] }
  0xba   : > { %2042 = vmatprep.subr.mxu0 %v3961_v26  ;;  %2011 = vmatpush3.msra.mxu1 %v3962_v43  ;;  %v3971_v35 = vand.u32 4294901760, %v3970_v41  ;;  %v3972_v26 = vand.u32 4294901760, %v2976_v50  ;;  %v3976_v50 = vand.u32 4294901760, %v3955_v32  ;;  %v4024_v32 = vld [vmem:[#allocation36_spill] sm:$0xff]  ;;  %v4026_v41 = vld [vmem:[#allocation49_spill] sm:$0xff] }
  0xbb   : > { %2043 = vmatpush3.msra.mxu0 %v3963_v18  ;;  %2012 = vmatprep.subr.mxu1 %v3964_v31  ;;  %v4027_v18 = vld [vmem:[#allocation39_spill] sm:$0xff] }
  0xbc   : > { %2044 = vmatprep.subr.mxu0 %v3966_v44  ;;  %982 = vmatprep.mubr.f32.mxu0 %v3967_v52  ;;  %v3974_v44 = vand.u32 4294901760, %v2749_v8  ;;  %v3979_v8 = vand.u32 4294901760, %v3959_v62 }
  0xbd   : > { %2013 = vmatpush3.msra.mxu1 %v3968_v51  ;;  %1134 = vmatprep.mubr.f32.mxu1 %v3969_v2  ;;  %v3975_v2 = vand.u32 4294901760, %v2760_v42  ;;  %v3982_v42 = vand.u32 4294901760, %v2819_v54  ;;  %v3989_v54 = vand.u32 4294901760, %v2875_v60  ;;  %v3994_v60 = vand.u32 4294901760, %v2912_v29 }
  0xbe   : > { %2045 = vmatpush3.msra.mxu0 %v3971_v35  ;;  %1138 = vmatmul.mubr.f32.vlgmr.msra.gmra.mxu1 %v3972_v26  ;;  %v4029_v35 = vand.u32 4294901760, %v3203_v37  ;;  %v4030_v26 = vld [vmem:[#allocation40_spill] sm:$0xff] }
  0xbf   : > { %985 = vmatmul.mubr.f32.gmra.mxu0 %v3087_v25  ;;  %2046 = vmatprep.subr.mxu0 %v3973_v40  ;;  %v4031_v40 = vld [vmem:[#allocation55_spill] sm:$0xff] }
  0xc0   : > { %2094 = vmatprep.subr.mxu1 %v2611_v3  ;;  %2047 = vmatpush3.msra.mxu0 %v3974_v44  ;;  %v3978_v3 = vld [vmem:[#allocation64_spill] sm:$0xff]  ;;  %v4038_v44 = vld [vmem:[#allocation65_spill] sm:$0xff] }
  0xc1   : > { %2095 = vmatpush3.msra.mxu1 %v2613_v4  ;;  %2048 = vmatprep.subr.mxu0 %v3975_v2  ;;  %v3980_v4 = vand.u32 4294901760, %v2786_v57  ;;  %v3986_v57 = vand.u32 4294901760, %v3087_v25  ;;  %v3991_v25 = vand.u32 4294901760, %v2886_v27  ;;  %v3998_v27 = vand.u32 4294901760, %v3112_v24  ;;  %v4039_v2 = vld [vmem:[#allocation67_spill] sm:$0xff] }
  0xc2   : > { %2096 = vmatprep.subr.mxu1 %v2615_v5  ;;  %991 = vmatprep.mubr.f32.mxu0 %v3090_v23  ;;  %v3981_v5 = vand.u32 4294901760, %v2798_v6  ;;  %v3997_v6 = vld [vmem:[#allocation69_spill] sm:$0xff] }
  0xc3   : > { %1145 = vmatprep.mubr.f32.mxu1 %v3976_v50  ;;  %2049 = vmatpush3.msra.mxu0 %v3977_v0  ;;  %v4040_v50 = vld [vmem:[#allocation68_spill] sm:$0xff]  ;;  %v4041_v0 = vld [vmem:[#allocation71_spill] sm:$0xff] }
  0xc4   : > { %2097 = vmatpush3.msra.mxu1 %v2617_v9  ;;  %994 = vmatmul.mubr.f32.gmra.mxu0 %v3978_v3  ;;  %v3983_v9 = vand.u32 4294901760, %v3967_v52  ;;  %v4028_v52 = vld [vmem:[#allocation51_spill] sm:$0xff] }
  0xc5   : > { %1149 = vmatmul.mubr.f32.gmra.mxu1 %v3979_v8  ;;  %2050 = vmatprep.subr.mxu0 %v3980_v4 }
  0xc6   : > { %2098 = vmatprep.subr.mxu1 %v2619_v10  ;;  %2051 = vmatpush3.msra.mxu0 %v3981_v5  ;;  %v3985_v10 = vld [vmem:[#allocation66_spill] sm:$0xff] }
  0xc7   : > { %2099 = vmatpush3.msra.mxu1 %v2621_v11  ;;  %2052 = vmatprep.subr.mxu0 %v3982_v42  ;;  %v3987_v11 = vand.u32 4294901760, %v2850_v55  ;;  %v3999_v55 = vand.u32 4294901760, %v2951_v7  ;;  %v4001_v29 = vand.u32 4294901760, %v3985_v10  ;;  %v4005_v7 = vld [vmem:[#allocation73_spill] sm:$0xff] }
  0xc8   : > { %2100 = vmatprep.subr.mxu1 %v2624_v15  ;;  %1000 = vmatprep.mubr.f32.mxu0 %v3112_v24  ;;  %v3988_v15 = vand.u32 4294901760, %v2863_v58  ;;  %v4000_v58 = vld [vmem:[#allocation70_spill] sm:$0xff]  ;;  %v4004_v24 = vand.u32 4294901760, %v2981_v38  ;;  %v4009_v38 = vand.u32 4294901760, %v3023_v61  ;;  %v4020_v61 = vld [vmem:[#allocation45_spill] sm:$0xff]  ;;  %v4025_v62 = vand.u32 4294901760, %v4005_v7 }
  0xc9   : > { %1156 = vmatprep.mubr.f32.mxu1 %v3983_v9  ;;  %2053 = vmatpush3.msra.mxu0 %v3984_v48 }
  0xca   : > { %2101 = vmatpush3.msra.mxu1 %v2626_v16  ;;  %1003 = vmatmul.mubr.f32.gmra.mxu0 %v3985_v10  ;;  %v3990_v16 = vand.u32 4294901760, %v3090_v23  ;;  %v3995_v23 = vand.u32 4294901760, %v2932_v12  ;;  %v4002_v12 = vand.u32 4294901760, %v2961_v21  ;;  %v4007_v21 = vand.u32 4294901760, %v3008_v19 }
  0xcb   : > { %1160 = vmatmul.mubr.f32.gmra.mxu1 %v3986_v57  ;;  %2054 = vmatprep.subr.mxu0 %v3987_v11  ;;  %v4015_v19 = vand.u32 4294901760, %v4014_v33 }
  0xcc   : > { %2102 = vmatprep.subr.mxu1 %v2628_v17  ;;  %2055 = vmatpush3.msra.mxu0 %v3988_v15  ;;  %v3992_v17 = vand.u32 4294901760, %v3978_v3  ;;  %v4042_v3 = vld [vmem:[#allocation72_spill] sm:$0xff] }
  0xcd   : > { %2103 = vmatpush3.msra.mxu1 %v2641_v22  ;;  %2056 = vmatprep.subr.mxu0 %v3989_v54  ;;  %v3993_v22 = vand.u32 4294901760, %v3931_v56  ;;  %v4008_v56 = vand.u32 4294901760, %v3146_v46 }
  0xce   : > { %2104 = vmatprep.subr.mxu1 %v3929_v34  ;;  %1009 = vmatprep.mubr.f32.mxu0 %v3131_v59  ;;  %v4013_v59 = vld [vmem:[#allocation33_spill] sm:$0xff]  ;;  %v4016_v34 = vld [vmem:[#allocation34_spill] sm:$0xff] }
  0xcf   : > { %1167 = vmatprep.mubr.f32.mxu1 %v3990_v16  ;;  %2057 = vmatpush3.msra.mxu0 %v3991_v25 }
  0xd0   : > { %2105 = vmatpush3.msra.mxu1 %v3930_v1  ;;  %1012 = vmatmul.mubr.f32.gmra.mxu0 %v3146_v46  ;;  %v4018_v46 = vld [vmem:[#allocation56_spill] sm:$0xff] }
  0xd1   : > { %1171 = vmatmul.mubr.f32.gmra.mxu1 %v3992_v17  ;;  %2058 = vmatprep.subr.mxu0 %v3993_v22 }
  0xd2   : > { %2106 = vmatprep.subr.mxu1 %v3932_v47  ;;  %2059 = vmatpush3.msra.mxu0 %v3994_v60  ;;  %v4019_v47 = vand.u32 4294901760, %v4018_v46 }
  0xd3   : > { %2107 = vmatpush3.msra.mxu1 %v3933_v14  ;;  %2060 = vmatprep.subr.mxu0 %v3995_v23  ;;  %v4010_v14 = vld [vmem:[#allocation32_spill] sm:$0xff] }
  0xd4   : > { %2108 = vmatprep.subr.mxu1 %v3996_v63  ;;  %1018 = vmatprep.mubr.f32.mxu0 %v3997_v6 }
  0xd5   : > { %1178 = vmatprep.mubr.f32.mxu1 %v3998_v27  ;;  %2061 = vmatpush3.msra.mxu0 %v3999_v55 }
  0xd6   : > { %2109 = vmatpush3.msra.mxu1 %v3935_v45  ;;  %1021 = vmatmul.mubr.f32.gmra.mxu0 %v4000_v58  ;;  %v4022_v45 = vld [vmem:[#allocation47_spill] sm:$0xff] }
  0xd7   : > { %1182 = vmatmul.mubr.f32.gmra.mxu1 %v4001_v29  ;;  %2062 = vmatprep.subr.mxu0 %v4002_v12 }
  0xd8   : > { %2110 = vmatprep.subr.mxu1 %v3936_v28  ;;  %2063 = vmatpush3.msra.mxu0 %v4003_v49  ;;  %v4017_v28 = vand.u32 4294901760, %v3997_v6 }
  0xd9   : > { %2111 = vmatpush3.msra.mxu1 %v3938_v39  ;;  %2064 = vmatprep.subr.mxu0 %v4004_v24  ;;  %v4021_v39 = vld [vmem:[#allocation35_spill] sm:$0xff] }
  0xda   : > { %2112 = vmatprep.subr.mxu1 %v3939_v36  ;;  %1027 = vmatprep.mubr.f32.mxu0 %v4005_v7  ;;  %v4011_v36 = vld [vmem:[#allocation52_spill] sm:$0xff] }
  0xdb   : > { %1189 = vmatprep.mubr.f32.mxu1 %v4006_v20  ;;  %2065 = vmatpush3.msra.mxu0 %v4007_v21  ;;  %v4012_v1 = vand.u32 4294901760, %v4011_v36 }
  0xdc   : > { %2113 = vmatpush3.msra.mxu1 %v3940_v13  ;;  %1030 = vmatmul.mubr.f32.gmra.mxu0 %v3203_v37  ;;  %v4023_v13 = vand.u32 4294901760, %v4000_v58  ;;  %v4034_v37 = vld [vmem:[#allocation60_spill] sm:$0xff] }
  0xdd   : > { %1193 = vmatmul.mubr.f32.gmra.mxu1 %v4008_v56  ;;  %2066 = vmatprep.subr.mxu0 %v4009_v38 }
  0xde   : > { %2114 = vmatprep.subr.mxu1 %v4010_v14  ;;  %2067 = vmatpush3.msra.mxu0 %v4012_v1 }
  0xdf   : > { %2115 = vmatpush3.msra.mxu1 %v4013_v59  ;;  %2068 = vmatprep.subr.mxu0 %v4015_v19 }
  0xe0   : > { %2116 = vmatprep.subr.mxu1 %v4016_v34  ;;  %1200 = vmatprep.mubr.f32.mxu1 %v4017_v28 }
  0xe1   : > { %2069 = vmatpush3.msra.mxu0 %v4019_v47  ;;  %1381 = vmatprep.mubr.f32.mxu0 %v4020_v61 }
  0xe2   : > { %2117 = vmatpush3.msra.mxu1 %v4021_v39  ;;  %1383 = vmatmul.mubr.f32.vlgmr.msra.gmra.mxu0 %v4022_v45 }
  0xe3   : > { %1204 = vmatmul.mubr.f32.gmra.mxu1 %v4023_v13  ;;  %2118 = vmatprep.subr.mxu1 %v4024_v32 }
  0xe4   : > { %2119 = vmatpush3.msra.mxu1 %v3949_v53  ;;  %1211 = vmatprep.mubr.f32.mxu1 %v4025_v62  ;;  %v4032_v53 = vld [vmem:[#allocation58_spill] sm:$0xff] }
  0xe5   : > { %2120 = vmatprep.subr.mxu1 %v3952_v30  ;;  %1388 = vmatprep.mubr.f32.mxu0 %v4026_v41  ;;  %v4033_v30 = vld [vmem:[#allocation59_spill] sm:$0xff] }
  0xe6   : > { %2121 = vmatpush3.msra.mxu1 %v4027_v18  ;;  %1390 = vmatmul.mubr.f32.gmra.mxu0 %v4028_v52 }
  0xe7   : > { %1215 = vmatmul.mubr.f32.gmra.mxu1 %v4029_v35  ;;  %2122 = vmatprep.subr.mxu1 %v4030_v26  ;;  %v1590_v26 = vld [vmem:[%s2593_s11] sm:$0xff] }
  0xe8   : > { %2123 = vmatpush3.msra.mxu1 %v3962_v43  ;;  %1395 = vmatprep.mubr.f32.mxu0 %v4031_v40  ;;  %v4035_v43 = vld [vmem:[#allocation61_spill] sm:$0xff] }
  0xe9   : > { %2124 = vmatprep.subr.mxu1 %v3964_v31  ;;  %1534 = vmatprep.mubr.f32.mxu1 %v4020_v61  ;;  %v4036_v31 = vld [vmem:[#allocation62_spill] sm:$0xff] }
  0xea   : > { %2125 = vmatpush3.msra.mxu1 %v3968_v51  ;;  %1397 = vmatmul.mubr.f32.gmra.mxu0 %v4032_v53  ;;  %v4037_v51 = vld [vmem:[#allocation63_spill] sm:$0xff] }
  0xeb   : > { %1536 = vmatmul.mubr.f32.vlgmr.msra.gmra.mxu1 %v4022_v45  ;;  %1402 = vmatprep.mubr.f32.mxu0 %v4033_v30 }
  0xec   : > { %1541 = vmatprep.mubr.f32.mxu1 %v4026_v41 }
  0xee   : > { %1404 = vmatmul.mubr.f32.gmra.mxu0 %v4034_v37 }
  0xef   : > { %1543 = vmatmul.mubr.f32.gmra.mxu1 %v4028_v52  ;;  %1409 = vmatprep.mubr.f32.mxu0 %v4035_v43 }
  0xf0   : > { %1548 = vmatprep.mubr.f32.mxu1 %v4031_v40 }
  0xf2   : > { %1411 = vmatmul.mubr.f32.gmra.mxu0 %v4036_v31 }
  0xf3   : > { %1550 = vmatmul.mubr.f32.gmra.mxu1 %v4032_v53  ;;  %1416 = vmatprep.mubr.f32.mxu0 %v4037_v51  ;;  %v1591_v53 = vld [vmem:[%s2593_s11 + $0x8] sm:$0xff] }
  0xf4   : > { %1555 = vmatprep.mubr.f32.mxu1 %v4033_v30  ;;  %v1598_v30 = vmul.f32 0.5, %v1590_v26  ;;  %v1593_v26 = vld [vmem:[%s2593_s11 + $0x18] sm:$0xff] }
  0xf6   : > { %1418 = vmatmul.mubr.f32.gmra.mxu0 %v4038_v44  ;;  %2234 = vtanh.f32 %v1598_v30 }
  0xf7   : > { %1557 = vmatmul.mubr.f32.gmra.mxu1 %v4034_v37  ;;  %1423 = vmatprep.mubr.f32.mxu0 %v4039_v2 }
  0xf8   : > { %1562 = vmatprep.mubr.f32.mxu1 %v4035_v43 }
  0xfa   : > { %1425 = vmatmul.mubr.f32.gmra.mxu0 %v4040_v50 }
  0xfb   : > { %1564 = vmatmul.mubr.f32.gmra.mxu1 %v4036_v31  ;;  %1430 = vmatprep.mubr.f32.mxu0 %v4041_v0  ;;  %v1599_v31 = vmul.f32 0.5, %v1591_v53  ;;  %v1601_v53 = vmul.f32 0.5, %v1593_v26 }
  0xfc   : > { %1569 = vmatprep.mubr.f32.mxu1 %v4037_v51 }
  0xfd   : > { %2236 = vtanh.f32 %v1599_v31 }
  0xfe   : > { %1432 = vmatmul.mubr.f32.gmra.mxu0 %v4042_v3 }
  0xff   : > { %1571 = vmatmul.mubr.f32.gmra.mxu1 %v4038_v44  ;;  %v1592_v44 = vld [vmem:[%s2593_s11 + $0x10] sm:$0xff] }
 0x100   : > { %1576 = vmatprep.mubr.f32.mxu1 %v4039_v2 }
 0x103   : > { %1578 = vmatmul.mubr.f32.gmra.mxu1 %v4040_v50  ;;  %v1600_v50 = vmul.f32 0.5, %v1592_v44  ;;  %v1595_v44 = vld [vmem:[%s2593_s11 + $0x28] sm:$0xff] }
 0x104   : > { %1583 = vmatprep.mubr.f32.mxu1 %v4041_v0 }
 0x105   : > { %2238 = vtanh.f32 %v1600_v50 }
 0x106   : > { %2240 = vtanh.f32 %v1601_v53 }
 0x107   : > { %1585 = vmatmul.mubr.f32.gmra.mxu1 %v4042_v3 }
 0x144   : > { %v3439_v8 = vpop.f32.mrf.mxu0 }
 0x146   : > { %v3441_v4 = vpop.f32.mrf.mxu0 }
 0x14b   : > { %v3443_v5 = vpop.f32.mrf.mxu0 }
 0x14d   : > { %v3445_v42 = vpop.f32.mrf.mxu0 }
 0x14e   : > { %v3447_v9 = vpop.f32.mrf.mxu1 }
 0x150   : > { %v3451_v10 = vpop.f32.mrf.mxu1 }
 0x151   : > { %v3449_v48 = vpop.f32.mrf.mxu0  ;;  %v1904_v30 = vadd.f32 %v3451_v10, %v3447_v9 }
 0x153   : > { %v3453_v57 = vpop.f32.mrf.mxu0 }
 0x155   : > { %v3455_v11 = vpop.f32.mrf.mxu0  ;;  %v3457_v15 = vpop.f32.mrf.mxu1 }
 0x157   : > { %v3459_v54 = vpop.f32.mrf.mxu0  ;;  %v3461_v16 = vpop.f32.mrf.mxu1 }
 0x158   : > { %v1907_v9 = vadd.f32 %v3461_v16, %v3457_v15 }
 0x15a   : > { %v3463_v25 = vpop.f32.mrf.mxu0 }
 0x15b   : > { %v3465_v17 = vpop.f32.mrf.mxu1 }
 0x15c   : > { %v3467_v22 = vpop.f32.mrf.mxu0 }
 0x15d   : > { %v3469_v60 = vpop.f32.mrf.mxu1 }
 0x160   : > { %v3471_v23 = vpop.f32.mrf.mxu0 }
 0x161   : > { %v3473_v63 = vpop.f32.mrf.mxu1 }
 0x162   : > { %v3475_v6 = vpop.f32.mrf.mxu0 }
 0x163   : > { %v3477_v27 = vpop.f32.mrf.mxu1 }
 0x166   : > { %v3479_v55 = vpop.f32.mrf.mxu0 }
 0x167   : > { %4043 = vst [vmem:[#allocation18_spill] sm:$0xff] %v3479_v55  ;;  %v3481_v58 = vpop.f32.mrf.mxu1 }
 0x168   : > { %v3483_v29 = vpop.f32.mrf.mxu0 }
 0x169   : > { %4044 = vst [vmem:[#allocation20_spill] sm:$0xff] %v3483_v29  ;;  %v3485_v12 = vpop.f32.mrf.mxu1  ;;  %v2235_v29 = vpop.eup %2234 }
 0x16c   : > { %v3487_v49 = vpop.f32.mrf.mxu0 }
 0x16d   : > { %4045 = vst [vmem:[#allocation41_spill] sm:$0xff] %v3487_v49  ;;  %v3489_v24 = vpop.f32.mrf.mxu1 }
 0x16e   : > { %v3491_v7 = vpop.f32.mrf.mxu0 }
 0x16f   : > { %4046 = vst [vmem:[#allocation22_spill] sm:$0xff] %v3491_v7  ;;  %v3493_v20 = vpop.f32.mrf.mxu1 }
 0x172   : > { %v1958_v21 = vpop.f32.mrf.mxu0 }
 0x173   : > { %v3495_v56 = vpop.f32.mrf.mxu1 }
 0x174   : > { %v1959_v14 = vpop.f32.mrf.mxu0 }
 0x175   : > { %v3497_v38 = vpop.f32.mrf.mxu1  ;;  %v1960_v50 = vadd.f32 %v1959_v14, %v1958_v21 }
 0x176   : > { %4047 = vst [vmem:[#allocation23_spill] sm:$0xff] %v3497_v38 }
 0x178   : > { %v3499_v36 = vpop.f32.mrf.mxu1 }
 0x179   : > { %4048 = vst [vmem:[#allocation26_spill] sm:$0xff] %v3499_v36  ;;  %v3501_v1 = vpop.f32.mrf.mxu0  ;;  %v1594_v36 = vld [vmem:[%s2593_s11 + $0x20] sm:$0xff] }
 0x17a   : > { %v3503_v59 = vpop.f32.mrf.mxu1 }
 0x17b   : > { %4049 = vst [vmem:[#allocation28_spill] sm:$0xff] %v3503_v59  ;;  %v1962_v33 = vpop.f32.mrf.mxu0 }
 0x17c   : > { %v1963_v21 = vadd.f32 %v1962_v33, %v3501_v1 }
 0x17e   : > { %v2014_v19 = vpop.f32.mrf.mxu1 }
 0x17f   : > { %v3505_v34 = vpop.f32.mrf.mxu0 }
 0x180   : > { %v2015_v46 = vpop.f32.mrf.mxu1 }
 0x181   : > { %v3507_v28 = vpop.f32.mrf.mxu0  ;;  %v2016_v10 = vadd.f32 %v2015_v46, %v2014_v19 }
 0x182   : > { %v1966_v1 = vadd.f32 %v3507_v28, %v3505_v34 }
 0x184   : > { %v3509_v47 = vpop.f32.mrf.mxu0 }
 0x185   : > { %v3511_v61 = vpop.f32.mrf.mxu1 }
 0x186   : > { %v3513_v39 = vpop.f32.mrf.mxu0 }
 0x187   : > { %v3515_v45 = vpop.f32.mrf.mxu1 }
 0x188   : > { %v2019_v46 = vadd.f32 %v3515_v45, %v3511_v61  ;;  %v1913_v61 = vadd.f32 %v3477_v27, %v3473_v63 }
 0x18a   : > { %v3517_v13 = vpop.f32.mrf.mxu0 }
 0x18b   : > { %v3519_v32 = vpop.f32.mrf.mxu1 }
 0x18c   : > { %v3521_v62 = vpop.f32.mrf.mxu0 }
 0x18d   : > { %v3523_v41 = vpop.f32.mrf.mxu1 }
 0x190   : > { %v3525_v18 = vpop.f32.mrf.mxu0 }
 0x191   : > { %v3527_v52 = vpop.f32.mrf.mxu1 }
 0x192   : > { %v3529_v35 = vpop.f32.mrf.mxu0 }
 0x193   : > { %v3532_v40 = vpop.f32.mrf.mxu1 }
 0x196   : > { %v3535_v37 = vpop.f32.mrf.mxu0 }
 0x197   : > { %4050 = vst [vmem:[#allocation48_spill] sm:$0xff] %v3535_v37  ;;  %v3537_v43 = vpop.f32.mrf.mxu1  ;;  %v1602_v37 = vmul.f32 0.5, %v1594_v36  ;;  %v1596_v36 = vld [vmem:[%s2593_s11 + $0x30] sm:$0xff] }
 0x198   : > { %v3539_v51 = vpop.f32.mrf.mxu0 }
 0x199   : > { %4051 = vst [vmem:[#allocation29_spill] sm:$0xff] %v3539_v51  ;;  %v3542_v2 = vpop.f32.mrf.mxu1  ;;  %2242 = vtanh.f32 %v1602_v37 }
 0x19c   : > { %v3544_v0 = vpop.f32.mrf.mxu0 }
 0x19d   : > { %4052 = vst [vmem:[#allocation30_spill] sm:$0xff] %v3544_v0  ;;  %v3546_v3 = vpop.f32.mrf.mxu1 }
 0x19e   : > { %4053 = vst [vmem:[#allocation31_spill] sm:$0xff] %v3546_v3  ;;  %v3549_v7 = vpop.f32.mrf.mxu0 }
 0x19f   : > { %4054 = vst [vmem:[#allocation46_spill] sm:$0xff] %v3549_v7  ;;  %v3551_v49 = vpop.f32.mrf.mxu1  ;;  %v1848_v7 = vadd.f32 %v3441_v4, %v3439_v8  ;;  %v1851_v8 = vadd.f32 %v3445_v42, %v3443_v5  ;;  %v1604_v5 = vmul.f32 0.5, %v1596_v36  ;;  %v1854_v42 = vadd.f32 %v3453_v57, %v3449_v48 }
 0x1a0   : > { %4055 = vst [vmem:[#allocation16_spill] sm:$0xff] %v3551_v49  ;;  %v1603_v49 = vmul.f32 0.5, %v1595_v44  ;;  %v2022_v48 = vadd.f32 %v3523_v41, %v3519_v32  ;;  %v1916_v41 = vadd.f32 %v3485_v12, %v3481_v58  ;;  %v1972_v58 = vadd.f32 %v3521_v62, %v3517_v13 }
 0x1a1   : > { %v782_v3 = vadd.f32 %v1904_v30, %v1848_v7  ;;  %v1910_v7 = vadd.f32 %v3469_v60, %v3465_v17  ;;  %v789_v19 = vadd.f32 %v1907_v9, %v1851_v8 }
 0x1a2   : > { %v2070_v59 = vpop.f32.mrf.mxu0  ;;  %2244 = vtanh.f32 %v1603_v49 }
 0x1a3   : > { %v3554_v51 = vpop.f32.mrf.mxu1  ;;  %v969_v4 = vadd.f32 %v1960_v50, %v782_v3  ;;  %v978_v60 = vadd.f32 %v1963_v21, %v789_v19  ;;  %v796_v50 = vadd.f32 %v1910_v7, %v1854_v42  ;;  %2246 = vtanh.f32 %v1604_v5 }
 0x1a4   : > { %4056 = vst [vmem:[#allocation37_spill] sm:$0xff] %v3554_v51  ;;  %v2071_v31 = vpop.f32.mrf.mxu0  ;;  %v2237_v51 = vpop.eup %2236 }
 0x1a5   : > { %v3559_v0 = vpop.f32.mrf.mxu1  ;;  %v2072_v14 = vadd.f32 %v2071_v31, %v2070_v59  ;;  %v1615_v15 = vmul.f32 0.5, %v2237_v51  ;;  %v2239_v16 = vpop.eup %2238  ;;  %v1597_v31 = vld [vmem:[%s2593_s11 + $0x38] sm:$0xff]  ;;  %v1151_v36 = vadd.f32 %v2019_v46, %v978_v60 }
 0x1a6   : > { %4057 = vst [vmem:[#allocation17_spill] sm:$0xff] %v3559_v0  ;;  %v2073_v26 = vpop.f32.mrf.mxu0  ;;  %v1614_v0 = vmul.f32 0.5, %v2235_v29  ;;  %v1140_v29 = vadd.f32 %v2016_v10, %v969_v4  ;;  %v1616_v10 = vmul.f32 0.5, %v2239_v16  ;;  %v2241_v28 = vpop.eup %2240  ;;  %v1605_v27 = vmul.f32 0.5, %v1597_v31 }
 0x1a7   : > { %v3563_v55 = vpop.f32.mrf.mxu1  ;;  %v1623_v9 = vadd.f32 0.5, %v1615_v15 }
 0x1a8   : > { %v2074_v53 = vpop.f32.mrf.mxu0  ;;  %v1622_v17 = vadd.f32 0.5, %v1614_v0  ;;  %v1385_v33 = vadd.f32 %v2072_v14, %v1140_v29  ;;  %v1857_v0 = vadd.f32 %v3459_v54, %v3455_v11  ;;  %v1624_v15 = vadd.f32 0.5, %v1616_v10  ;;  %v2243_v29 = vpop.eup %2242 }
 0x1a9   : > { %v3567_v38 = vpop.f32.mrf.mxu1  ;;  %v2075_v49 = vadd.f32 %v2074_v53, %v2073_v26  ;;  %v987_v26 = vadd.f32 %v1966_v1, %v796_v50  ;;  %v1969_v53 = vadd.f32 %v3513_v39, %v3509_v47  ;;  %v2025_v11 = vadd.f32 %v3532_v40, %v3527_v52 }
 0x1aa   : > { %v2076_v44 = vpop.f32.mrf.mxu0  ;;  %v803_v32 = vadd.f32 %v1913_v61, %v1857_v0  ;;  %v1617_v39 = vmul.f32 0.5, %v2241_v28  ;;  %2248 = vtanh.f32 %v1605_v27  ;;  %v1919_v1 = vadd.f32 %v3493_v20, %v3489_v24  ;;  %v4061_v28 = vld [vmem:[#allocation18_spill] sm:$0xff]  ;;  %v4062_v0 = vld [vmem:[#allocation20_spill] sm:$0xff]  ;;  %v4064_v27 = vld [vmem:[#allocation29_spill] sm:$0xff] }
 0x1ab   : > { %v2126_v30 = vpop.f32.mrf.mxu1  ;;  %v1392_v8 = vadd.f32 %v2075_v49, %v1151_v36  ;;  %v1162_v16 = vadd.f32 %v2022_v48, %v987_v26  ;;  %v1618_v24 = vmul.f32 0.5, %v2243_v29  ;;  %v4059_v48 = vld [vmem:[#allocation31_spill] sm:$0xff]  ;;  %v1866_v26 = vadd.f32 %v4062_v0, %v4061_v28  ;;  %v4069_v29 = vld [vmem:[#allocation41_spill] sm:$0xff] }
 0x1ac   : > { %v2077_v37 = vpop.f32.mrf.mxu0  ;;  %v996_v19 = vadd.f32 %v1969_v53, %v803_v32  ;;  %v1625_v60 = vadd.f32 0.5, %v1617_v39  ;;  %v4067_v39 = vld [vmem:[#allocation37_spill] sm:$0xff] }
 0x1ad   : > { %v2127_v59 = vpop.f32.mrf.mxu1  ;;  %v2078_v4 = vadd.f32 %v2077_v37, %v2076_v44  ;;  %v1860_v44 = vadd.f32 %v3467_v22, %v3463_v25  ;;  %v2028_v22 = vadd.f32 %v3542_v2, %v3537_v43  ;;  %v4058_v2 = vld [vmem:[#allocation23_spill] sm:$0xff] }
 0x1ae   : > { %v2128_v51 = vadd.f32 %v2127_v59, %v2126_v30  ;;  %v2079_v3 = vpop.f32.mrf.mxu0  ;;  %v1173_v25 = vadd.f32 %v2025_v11, %v996_v19 }
 0x1af   : > { %v2129_v45 = vpop.f32.mrf.mxu1  ;;  %v1399_v52 = vadd.f32 %v2078_v4, %v1162_v16  ;;  %v810_v42 = vadd.f32 %v1916_v41, %v1860_v44  ;;  %v4068_v44 = vld [vmem:[#allocation17_spill] sm:$0xff] }
 0x1b0   : > { %v1538_v57 = vadd.f32 %v2128_v51, %v1385_v33  ;;  %v2080_v34 = vpop.f32.mrf.mxu0  ;;  %v1863_v33 = vadd.f32 %v3475_v6, %v3471_v23  ;;  %v1975_v51 = vadd.f32 %v3529_v35, %v3525_v18  ;;  %v2034_v19 = vadd.f32 %v4068_v44, %v4067_v39 }
 0x1b1   : > { %v2130_v63 = vpop.f32.mrf.mxu1  ;;  %v2081_v40 = vadd.f32 %v2080_v34, %v2079_v3  ;;  %v1005_v49 = vadd.f32 %v1972_v58, %v810_v42 }
 0x1b2   : > { %v1630_v21 = vmul.f32 %v1622_v17, %v1538_v57  ;;  %v2131_v14 = vadd.f32 %v2130_v63, %v2129_v45  ;;  %v2082_v7 = vpop.f32.mrf.mxu0  ;;  %v2245_v17 = vpop.eup %2244  ;;  %v817_v43 = vadd.f32 %v1919_v1, %v1863_v33  ;;  %v4060_v57 = vld [vmem:[#allocation16_spill] sm:$0xff] }
 0x1b3   : > { %v2132_v30 = vpop.f32.mrf.mxu1  ;;  %v1406_v20 = vadd.f32 %v2081_v40, %v1173_v25  ;;  %v1184_v36 = vadd.f32 %v2028_v22, %v1005_v49  ;;  %v2031_v23 = vadd.f32 %v4060_v57, %v4059_v48  ;;  %v1619_v18 = vmul.f32 0.5, %v2245_v17  ;;  %v2247_v35 = vpop.eup %2246  ;;  %v4063_v63 = vld [vmem:[#allocation48_spill] sm:$0xff] }
 0x1b4   : > { %1638 = vst [vmem:[%s3596_s18] sm:$0xff] %v1630_v21  ;;  %v1545_v54 = vadd.f32 %v2131_v14, %v1392_v8  ;;  %v2083_v47 = vpop.f32.mrf.mxu0  ;;  %v1014_v53 = vadd.f32 %v1975_v51, %v817_v43  ;;  %v1978_v8 = vadd.f32 %v4064_v27, %v4063_v63 }
 0x1b5   : > { %v2133_v12 = vpop.f32.mrf.mxu1  ;;  %v2084_v31 = vadd.f32 %v2083_v47, %v2082_v7 }
 0x1b6   : > { %v1631_v46 = vmul.f32 %v1623_v9, %v1545_v54  ;;  %v2134_v37 = vadd.f32 %v2133_v12, %v2132_v30  ;;  %v2085_v5 = vpop.f32.mrf.mxu0  ;;  %v1922_v9 = vadd.f32 %v4058_v2, %v3495_v56  ;;  %v1626_v56 = vadd.f32 0.5, %v1618_v24  ;;  %v4065_v30 = vld [vmem:[#allocation26_spill] sm:$0xff] }
 0x1b7   : > { %v2135_v59 = vpop.f32.mrf.mxu1  ;;  %v1413_v21 = vadd.f32 %v2084_v31, %v1184_v36  ;;  %v1195_v47 = vadd.f32 %v2031_v23, %v1014_v53  ;;  %v1627_v12 = vadd.f32 0.5, %v1619_v18  ;;  %v2249_v17 = vpop.eup %2248 }
 0x1b8   : > { %1639 = vst [vmem:[%s3596_s18 + $0x8] sm:$0xff] %v1631_v46  ;;  %v1552_v13 = vadd.f32 %v2134_v37, %v1399_v52  ;;  %v2086_v62 = vpop.f32.mrf.mxu0  ;;  %v824_v41 = vadd.f32 %v1922_v9, %v1866_v26  ;;  %v4070_v52 = vld [vmem:[#allocation22_spill] sm:$0xff] }
 0x1b9   : > { %v2136_v3 = vpop.f32.mrf.mxu1  ;;  %v2087_v14 = vadd.f32 %v2086_v62, %v2085_v5  ;;  %v1869_v40 = vadd.f32 %v4070_v52, %v4069_v29  ;;  %v4071_v37 = vld [vmem:[#allocation30_spill] sm:$0xff] }
 0x1ba   : > { %v1632_v50 = vmul.f32 %v1624_v15, %v1552_v13  ;;  %v2137_v61 = vadd.f32 %v2136_v3, %v2135_v59  ;;  %v2088_v45 = vpop.f32.mrf.mxu0  ;;  %v4066_v15 = vld [vmem:[#allocation28_spill] sm:$0xff]  ;;  %v1023_v46 = vadd.f32 %v1978_v8, %v824_v41  ;;  %v4072_v5 = vld [vmem:[#allocation46_spill] sm:$0xff]  ;;  %v1620_v59 = vmul.f32 0.5, %v2247_v35 }
 0x1bb   : > { %v2138_v10 = vpop.f32.mrf.mxu1  ;;  %v1925_v16 = vadd.f32 %v4066_v15, %v4065_v30  ;;  %v1981_v42 = vadd.f32 %v4072_v5, %v4071_v37  ;;  %v1420_v25 = vadd.f32 %v2087_v14, %v1195_v47  ;;  %v2037_v3 = vadd.f32 %v3567_v38, %v3563_v55 }
 0x1bc   : > { %1640 = vst [vmem:[%s3596_s18 + $0x10] sm:$0xff] %v1632_v50  ;;  %v1559_v6 = vadd.f32 %v2137_v61, %v1406_v20  ;;  %v2089_v34 = vpop.f32.mrf.mxu0  ;;  %v1206_v51 = vadd.f32 %v2034_v19, %v1023_v46  ;;  %v1628_v50 = vadd.f32 0.5, %v1620_v59  ;;  %v1621_v61 = vmul.f32 0.5, %v2249_v17 }
 0x1bd   : > { %v2139_v4 = vpop.f32.mrf.mxu1  ;;  %v2090_v22 = vadd.f32 %v2089_v34, %v2088_v45 }
 0x1be   : > { %v1633_v7 = vmul.f32 %v1625_v60, %v1559_v6  ;;  %v2140_v32 = vadd.f32 %v2139_v4, %v2138_v10  ;;  %v2091_v11 = vpop.f32.mrf.mxu0  ;;  %v831_v60 = vadd.f32 %v1925_v16, %v1869_v40  ;;  %v1629_v6 = vadd.f32 0.5, %v1621_v61 }
 0x1bf   : > { %v2141_v54 = vpop.f32.mrf.mxu1  ;;  %v1427_v45 = vadd.f32 %v2090_v22, %v1206_v51 }
 0x1c0   : > { %1641 = vst [vmem:[%s3596_s18 + $0x18] sm:$0xff] %v1633_v7  ;;  %v1566_v58 = vadd.f32 %v2140_v32, %v1413_v21  ;;  %v2092_v33 = vpop.f32.mrf.mxu0  ;;  %v1032_v20 = vadd.f32 %v1981_v42, %v831_v60 }
 0x1c1   : > { %v2142_v1 = vpop.f32.mrf.mxu1  ;;  %v2093_v43 = vadd.f32 %v2092_v33, %v2091_v11 }
 0x1c2   : > { %v1634_v13 = vmul.f32 %v1626_v56, %v1566_v58  ;;  %v2143_v62 = vadd.f32 %v2142_v1, %v2141_v54  ;;  %v1217_v36 = vadd.f32 %v2037_v3, %v1032_v20 }
 0x1c3   : > { %v2144_v49 = vpop.f32.mrf.mxu1 }
 0x1c4   : > { %1642 = vst [vmem:[%s3596_s18 + $0x20] sm:$0xff] %v1634_v13  ;;  %v1573_v24 = vadd.f32 %v2143_v62, %v1420_v25  ;;  %v1434_v38 = vadd.f32 %v2093_v43, %v1217_v36 }
 0x1c5   : > { %v2145_v31 = vpop.f32.mrf.mxu1 }
 0x1c6   : > { %v1635_v2 = vmul.f32 %v1627_v12, %v1573_v24  ;;  %v2146_v9 = vadd.f32 %v2145_v31, %v2144_v49 }
 0x1c7   : > { %v2147_v10 = vpop.f32.mrf.mxu1 }
 0x1c8   : > { %1643 = vst [vmem:[%s3596_s18 + $0x28] sm:$0xff] %v1635_v2  ;;  %v1580_v48 = vadd.f32 %v2146_v9, %v1427_v45 }
 0x1c9   : > { %v2148_v55 = vpop.f32.mrf.mxu1 }
 0x1ca   : > { %v1636_v57 = vmul.f32 %v1628_v50, %v1580_v48  ;;  %v2149_v23 = vadd.f32 %v2148_v55, %v2147_v10 }
 0x1cc   : > { %1644 = vst [vmem:[%s3596_s18 + $0x30] sm:$0xff] %v1636_v57  ;;  %v1587_v34 = vadd.f32 %v2149_v23, %v1434_v38 }
 0x1ce   : > { %v1637_v18 = vmul.f32 %v1629_v6, %v1587_v34 }
 0x1d0   : > { %1645 = vst [vmem:[%s3596_s18 + $0x38] sm:$0xff] %v1637_v18 }
 0x1d1   : > { %2345 = shalt.err (!%p2342_p6)
}
 0x1d2   : > { %s2346_s19 = scalar_lea.hbm %s3640_s23, 1024  ;;  %s2350_s2 = scalar_lea.hbm %s3694_s3, 2048 }
 0x1d3   : > { %p2347_p9 = scmp.ne.s32.totalorder %s3640_s23, %s2346_s19  ;;  %p2351_p11 = scmp.lt.s32.totalorder %s3640_s23, %s3694_s3 }
 0x1d4   : > { %p2352_p3 = scmp.lt.s32.totalorder %s2350_s2, %s2346_s19 }
 0x1d5   : > { %p2348_p12 = pnand %p2347_p9, %p2538_p0 }
 0x1d6   : > { %p2353_p1 = por %p2352_p3, %p2351_p11 }
 0x1d7   : > { %p2349_p13 = pneg %p2348_p12 }
 0x1d9   : > { %p2354_p4 = pnand %p2353_p1, %p2349_p13 }
 0x1db   : > { %2357 = shalt.err (!%p2354_p4)
}
 0x1dc   : > { %s2430_s11 = smov 128   ;;  %s2431_s22 = smov 8  }
 0x1dd   : > { %2158 = dma.vmem_to_hbm [thread:$0]  (%p2538_p0), %s3642_s4, 1024, %s3640_s23, %s1647_s24, %s2430_s11, %s2430_s11, %s2431_s22  }
 0x1de PF: > { %s1676_s26 = sand.u32 1, %s2400_s12   ;;  %p4073_p8 = scmp.ne.s32.totalorder %s3843_s21, 0 }
 0x1df   : > { %s1677_s25 = scalar_lea.sflag [#allocation4], %s1676_s26 }
 0x1e0   : > { %p2172_p5 = pnand %p1792_p10, %p4073_p8 }
 0x1e2   : > { %p2173_p7 = pneg %p2172_p5 }
 0x1e4   : > { %2395 = dma.done.wait (%p2173_p7), %s1677_s25, 1024  }
 0x1e5   : > { %2397 = vsyncadd (%p2173_p7), %s1677_s25, 4294966272  ;;  %s22_s17 = sadd.s32 1, %s2420_s17   ;;  %s4074_s30 = sld [smem:[#allocation13_spill]] }
 0x1e6   : > { %p19_p2 = scmp.ge.s32.totalorder %s22_s17, 4   ;;  %s4075_s14 = sld [smem:[#allocation15_spill]] }
 0x1e7   : > { %s4076_s7 = sld [smem:[#allocation14_spill]]  ;;  %s4077_s12 = smov %s2404_s13 }
 0x1e8   : > { %s4079_s15 = smov %s2416_s16 }
 0x1e9   :  { %21 = sbr.rel (!%p19_p2) target bundleno = 11 (0xb), region = 95 }
 0x1eb   : > { %s4078_s13 = smov %s4074_s30 }
 0x1ed   : > { %s4080_s16 = smov %s4076_s7 }
 0x1ee   :  { %1682 = vsyncpa [#allocation3], 1 }
 0x1ef   :  { %1684 = vsyncpa [#allocation3 + $0x1], 1 }
 0x1f0   :  { %1685 = vsyncpa [#allocation6], 1 }
 0x1f1   :  { %1687 = vsyncpa [#allocation6 + $0x1], 1 }
 0x1f2   :  { %1688 = vsyncpa [#allocation4], 1 }
 0x1f3   :  { %1690 = vsyncpa [#allocation4 + $0x1], 1 }

</bundles_post_ra>
